<compile_context>
chip_gen: v6e
topology: v6e:2x2x1
jax: 0.10.0
libtpu: 0.0.40
codegen_flags: <defaults>
</compile_context>

<pallas_src>
import math

import numpy as np
import jax
import jax.numpy as jnp
from jax.experimental import pallas as pl
from jax.experimental.pallas import tpu as pltpu


_CONV_BRANCHES = ((3, 1), (3, 2), (3, 3), (1, 1))   # (kernel_size, dilation); stride = 4
_CONV_STRIDE = 4
_LN_EPS = 1e-5


# ----------------------------------------------------------------------------------
# Trace-time constant builders (pure numpy, depend only on shapes / hyperparameters).
# ----------------------------------------------------------------------------------
def _adaptive_avg_pool_matrix(in_len, out_len):
    """P[l, s] such that F.adaptive_avg_pool1d(x, out_len) == x @ P  (x: [..., in_len])."""
    p = np.zeros((in_len, out_len), np.float32)
    for s in range(out_len):
        a = (s * in_len) // out_len
        e = ((s + 1) * in_len + out_len - 1) // out_len
        p[a:e, s] = 1.0 / (e - a)
    return p


def _branch_geometry(shot_channel):
    lens = [(shot_channel - d * (k - 1) - 1) // _CONV_STRIDE + 1 for (k, d) in _CONV_BRANCHES]
    offs = [0]
    for l in lens[:-1]:
        offs.append(offs[-1] + l)
    taps = [(b, j, d) for b, (k, d) in enumerate(_CONV_BRANCHES) for j in range(k)]
    l_pad = int(-(-max(lens) // 64)) * 64            # pad each tap block to a x64 lane block
    return lens, offs, taps, l_pad


def _frame_gather_indices(seq_len, shot_num):
    """shotAvgPool's frame order (negative torch indices wrap to the end of the sequence)."""
    split = seq_len // shot_num
    idx = np.empty((shot_num, split), np.int32)
    for i in range(shot_num):
        frames = [split * i] + list(range((i - 1) * split + 1, i * split))
        idx[i] = [f % seq_len for f in frames]
    return idx, split


def _fold_constants(seq_len, emb, shot_num, shot_channel):
    """Fold (a) shotAvgPool's adaptive pool + per-tap stride-4/dilated column selection
    into p1a, and (b) concat-over-branches + AdaptiveAvgPool1d(C) into p2t (per-tap row
    layout, zero rows in the padding)."""
    lens, offs, taps, l_pad = _branch_geometry(shot_channel)
    split = seq_len // shot_num
    nt = len(taps) * l_pad
    p1 = _adaptive_avg_pool_matrix(split * emb, shot_channel)            # (split*emb, C)
    p2 = _adaptive_avg_pool_matrix(int(np.sum(lens)), shot_channel)      # (sum_L, C)
    p1a = np.zeros((split * emb, nt), np.float32)
    p2t = np.zeros((nt, shot_channel), np.float32)
    for t, (b, j, d) in enumerate(taps):
        cols = _CONV_STRIDE * np.arange(lens[b]) + d * j                 # conv tap positions
        p1a[:, t * l_pad:t * l_pad + lens[b]] = p1[:, cols]
        p2t[t * l_pad:t * l_pad + lens[b], :] = p2[offs[b]:offs[b] + lens[b], :]
    colsum = np.stack([p2[offs[b]:offs[b] + lens[b], :].sum(axis=0)
                       for b in range(len(_CONV_BRANCHES))])             # (n_branch, C)
    return p1a, p2t, colsum, taps, l_pad, nt


# ----------------------------------------------------------------------------------
# The fused Pallas kernel (single invocation, no grid at demo scale).
# ----------------------------------------------------------------------------------
def _shot_level_kernel(seq_ref, gath_ref, p1a_ref, wexp_ref, p2t_ref, biasp_ref,
                       wfct_ref, bfc_ref, gamma_ref, beta_ref, out_ref):
    f32 = jnp.float32
    seq = seq_ref[...]                                  # (seq_len, E) f32, residual path
    shot_num = gath_ref.shape[0]
    seq_len, emb = seq.shape

    # ---- shotAvgPool pooling + stride-4/dilated tap selection: ONE deep-K bf16 matmul ----
    # g[c, t*Lpad + tau] == seq_shot[c, 4*tau + d*j]  (zero in the per-tap padding columns)
    g = jnp.dot(gath_ref[...], p1a_ref[...], preferred_element_type=f32)     # (shot, NT)

    # ---- Conv1d channel mixing: K=shot VPU multiply-accumulate (no tiny MXU matmuls) ----
    y = wexp_ref[0] * g[0:1, :]
    for c in range(1, shot_num):                        # static, trip count = shot_num
        y = y + wexp_ref[c] * g[c:c + 1, :]             # (shot, NT) f32

    # ---- concat over branches + AdaptiveAvgPool1d(C): ONE matmul; conv biases pre-pooled ----
    pooled = jnp.dot(y.astype(p2t_ref.dtype), p2t_ref[...],
                     preferred_element_type=f32) + biasp_ref[...]            # (shot, C)

    # ---- fc_down_shot: Linear (weight pre-transposed, bf16) -> Tanh -> LayerNorm ----
    z = jnp.dot(pooled.astype(wfct_ref.dtype), wfct_ref[...],
                preferred_element_type=f32) + bfc_ref[...]                   # (shot, E)
    z = jnp.tanh(z)
    inv_e = 1.0 / emb
    mean = jnp.sum(z, axis=-1, keepdims=True) * inv_e                        # single-pass LN
    msq = jnp.sum(z * z, axis=-1, keepdims=True) * inv_e
    var = msq - mean * mean
    z = (z - mean) * jax.lax.rsqrt(var + _LN_EPS) * gamma_ref[...] + beta_ref[...]

    # ---- mergePooling as a sublane broadcast-add (no matmul) + residual, one full store ----
    split = seq_len // shot_num
    counts = [split] * (shot_num - 1) + [seq_len - split * (shot_num - 1)]
    pieces = []
    r0 = 0
    for s in range(shot_num):                           # static, trip count = shot_num
        r1 = r0 + counts[s]
        pieces.append(seq[r0:r1, :] + z[s:s + 1, :])    # (counts[s], E) via sublane broadcast
        r0 = r1
    out_ref[...] = jnp.concatenate(pieces, axis=0)


# ----------------------------------------------------------------------------------
# Wrapper.
# ----------------------------------------------------------------------------------
def shot_level_extraction_v2(seq, params, shot_num, shot_channel, input_channel):
    """seq: (1, seq_len, emb_size), emb_size == input_channel. Returns the same shape."""
    seq2d = seq[0].astype(jnp.float32)                  # squeeze batch dim
    seq_len, emb = seq2d.shape
    assert emb == input_channel, "residual add requires emb_size == input_channel"
    C = shot_channel

    # Trace-time constants (shape-only).
    frame_idx, split = _frame_gather_indices(seq_len, shot_num)
    p1a_np, p2t_np, colsum_np, taps, l_pad, nt = _fold_constants(seq_len, emb, shot_num, C)

    # Parameter-derived operands (tiny; all transposes / reshapes done here, not in kernel).
    conv_w = [params["conv%d_w" % (b + 1)] for b in range(len(_CONV_BRANCHES))]
    conv_b = [params["conv%d_b" % (b + 1)] for b in range(len(_CONV_BRANCHES))]
    # wexp[c_in, c_out, t*Lpad + tau] = W_b[c_out, c_in, j]  (broadcast across the tap block)
    wexp = jnp.concatenate(
        [jnp.broadcast_to(conv_w[b][:, :, j].T[:, :, None], (shot_num, shot_num, l_pad))
         for (b, j, _d) in taps], axis=2).astype(jnp.float32)               # (shot, shot, NT)
    biasp = jnp.zeros((shot_num, C), jnp.float32)
    for b in range(len(_CONV_BRANCHES)):
        biasp = biasp + jnp.outer(conv_b[b], jnp.asarray(colsum_np[b]))     # (shot, C)
    wfct = params["fc_w"].T.astype(jnp.bfloat16)                            # (C, E)
    bfc = params["fc_b"].reshape(1, input_channel).astype(jnp.float32)
    gamma = params["ln_w"].reshape(1, input_channel).astype(jnp.float32)
    beta = params["ln_b"].reshape(1, input_channel).astype(jnp.float32)

    # Runtime frame gather with static indices -> lane-dense (shot, split*emb) slab (bf16
    # for the MXU path; the f32 seq operand is kept only for the residual add).
    gath = seq2d[frame_idx.reshape(-1)].reshape(shot_num, split * emb).astype(jnp.bfloat16)

    operands = (seq2d, gath,
                jnp.asarray(p1a_np, jnp.bfloat16), wexp,
                jnp.asarray(p2t_np, jnp.bfloat16), biasp,
                wfct, bfc, gamma, beta)

    flops = 2 * shot_num * (split * emb * nt + shot_num * nt + nt * C + C * emb) + seq_len * emb
    bytes_accessed = sum(int(np.prod(o.shape)) * o.dtype.itemsize for o in operands) \
        + seq_len * emb * 4
    try:
        vmem_cap = int(pltpu.get_tpu_info().vmem_capacity_bytes)
    except Exception:
        vmem_cap = 64 * 1024 * 1024
    vmem_limit = min(max(vmem_cap // 4, 16 * 1024 * 1024), 64 * 1024 * 1024)

    vmem = pl.BlockSpec(memory_space=pltpu.MemorySpace.VMEM)
    out = pl.pallas_call(
        _shot_level_kernel,
        out_shape=jax.ShapeDtypeStruct((seq_len, emb), jnp.float32),
        in_specs=[vmem] * len(operands),
        out_specs=vmem,
        input_output_aliases={0: 0},                    # residual output reuses the seq buffer
        compiler_params=pltpu.CompilerParams(vmem_limit_bytes=vmem_limit),
        cost_estimate=pl.CostEstimate(flops=flops,
                                      transcendentals=shot_num * emb,
                                      bytes_accessed=bytes_accessed),
    )(*operands)
    return out[None]                                    # unsqueeze(0)


def init_params(key, shot_num, shot_channel, input_channel):
    """Deterministic parameters mirroring the PyTorch module's layer shapes."""
    keys = jax.random.split(key, 6)
    params = {}
    for b, (k, _) in enumerate(_CONV_BRANCHES):
        lim = 1.0 / math.sqrt(shot_num * k)
        params["conv%d_w" % (b + 1)] = jax.random.uniform(
            keys[b], (shot_num, shot_num, k), jnp.float32, minval=-lim, maxval=lim)
        params["conv%d_b" % (b + 1)] = jax.random.uniform(
            jax.random.fold_in(keys[b], 1), (shot_num,), jnp.float32, minval=-lim, maxval=lim)
    lim = 1.0 / math.sqrt(shot_channel)
    params["fc_w"] = jax.random.uniform(keys[4], (input_channel, shot_channel),
                                        jnp.float32, minval=-lim, maxval=lim)
    params["fc_b"] = jax.random.uniform(keys[5], (input_channel,),
                                        jnp.float32, minval=-lim, maxval=lim)
    params["ln_w"] = jnp.ones((input_channel,), jnp.float32)
    params["ln_b"] = jnp.zeros((input_channel,), jnp.float32)
    return params


# ----------------------------------------------------------------------------------
# Pure-numpy reference (mirrors the PyTorch forward op-by-op; independent of the fold).
# ----------------------------------------------------------------------------------
def _reference_forward_np(seq, params, shot_num, shot_channel, input_channel):
    seq2d = np.asarray(seq[0], np.float32)
    p = {k: np.asarray(v, np.float32) for k, v in params.items()}
    seq_len, emb = seq2d.shape
    split = seq_len // shot_num

    def adaptive_pool(x, out_len):                      # x: (..., L)
        L = x.shape[-1]
        cols = []
        for s in range(out_len):
            a = (s * L) // out_len
            e = ((s + 1) * L + out_len - 1) // out_len
            cols.append(x[..., a:e].mean(axis=-1))
        return np.stack(cols, axis=-1)

    rows = []
    for i in range(shot_num):
        frames = [split * i] + list(range((i - 1) * split + 1, i * split))
        rows.append(np.concatenate([seq2d[f] for f in frames], axis=0))   # negative f wraps
    seq_shot = adaptive_pool(np.stack(rows, 0), shot_channel)             # (shot, C)

    outs = []
    for b, (k, d) in enumerate(_CONV_BRANCHES):
        w, bb = p["conv%d_w" % (b + 1)], p["conv%d_b" % (b + 1)]
        L = (shot_channel - d * (k - 1) - 1) // _CONV_STRIDE + 1
        o = np.zeros((shot_num, L), np.float32)
        for tau in range(L):
            acc = bb.copy()
            for j in range(k):
                acc = acc + w[:, :, j] @ seq_shot[:, _CONV_STRIDE * tau + d * j]
            o[:, tau] = acc
        outs.append(o)
    pooled = adaptive_pool(np.concatenate(outs, axis=1), shot_channel)    # (shot, C)

    z = np.tanh(pooled @ p["fc_w"].T + p["fc_b"])
    mean = z.mean(-1, keepdims=True)
    var = ((z - mean) ** 2).mean(-1, keepdims=True)
    z = (z - mean) / np.sqrt(var + _LN_EPS) * p["ln_w"] + p["ln_b"]

    split_channel = seq_len // shot_num
    reps = [split_channel] * (shot_num - 1) + [seq_len - split_channel * (shot_num - 1)]
    merged = np.concatenate([np.broadcast_to(z[i:i + 1], (reps[i], emb))
                             for i in range(shot_num)], axis=0)
    return (seq2d + merged)[None]


if __name__ == "__main__":
    shot_num = 4
    seq_len = 16            # divisible by shot_num (the PyTorch code implicitly assumes it)
    input_channel = 128     # == emb_size so the residual add is well-defined; lane-dense
    shot_channel = 256      # small stand-in for the default 8096; multiple of 128 lanes

    key = jax.random.PRNGKey(0)
    kseq, kp = jax.random.split(key)
    seq = jax.random.normal(kseq, (1, seq_len, input_channel), jnp.float32)
    params = init_params(kp, shot_num, shot_channel, input_channel)

    out = shot_level_extraction_v2(seq, params, shot_num, shot_channel, input_channel)
    out = jax.block_until_ready(out)
    assert out.shape == (1, seq_len, input_channel)
    assert bool(jnp.all(jnp.isfinite(out)))

    ref = _reference_forward_np(seq, params, shot_num, shot_channel, input_channel)
    err = float(np.max(np.abs(np.asarray(out) - ref)))
    assert err < 1e-1, "kernel deviates from reference: max abs err %g" % err
    print("KERNEL_OK")
</pallas_src>

<mosaic_0001>
module attributes {stable_mosaic.version = 11 : i64} {
  func.func @_shot_level_kernel(%arg0: memref<16x128xf32, #tpu.memory_space<vmem>>, %arg1: memref<4x512xbf16, #tpu.memory_space<vmem>>, %arg2: memref<512x640xbf16, #tpu.memory_space<vmem>>, %arg3: memref<4x4x640xf32, #tpu.memory_space<vmem>>, %arg4: memref<640x256xbf16, #tpu.memory_space<vmem>>, %arg5: memref<4x256xf32, #tpu.memory_space<vmem>>, %arg6: memref<256x128xbf16, #tpu.memory_space<vmem>>, %arg7: memref<1x128xf32, #tpu.memory_space<vmem>>, %arg8: memref<1x128xf32, #tpu.memory_space<vmem>>, %arg9: memref<1x128xf32, #tpu.memory_space<vmem>>, %arg10: memref<16x128xf32, #tpu.memory_space<vmem>>) attributes {dimension_semantics = [], scalar_prefetch = 0 : i64, scratch_operands = 0 : i64, tpu.core_type = #tpu.core_type<tc>} {
    %c0 = arith.constant 0 : index
    %c0_0 = arith.constant 0 : index
    %0 = vector.load %arg0[%c0, %c0_0] : memref<16x128xf32, #tpu.memory_space<vmem>>, vector<16x128xf32>
    %c0_1 = arith.constant 0 : index
    %c0_2 = arith.constant 0 : index
    %1 = vector.load %arg1[%c0_1, %c0_2] : memref<4x512xbf16, #tpu.memory_space<vmem>>, vector<4x512xbf16>
    %c0_3 = arith.constant 0 : index
    %c0_4 = arith.constant 0 : index
    %2 = vector.load %arg2[%c0_3, %c0_4] : memref<512x640xbf16, #tpu.memory_space<vmem>>, vector<512x640xbf16>
    %cst = arith.constant dense<0.000000e+00> : vector<4x640xf32>
    %3 = tpu.matmul %1, %2, %cst {dimension_numbers = #tpu.dot_dimension_numbers<[1], [0], [0], [1], [0, 0, 1, 1], [], []>} : vector<4x512xbf16>, vector<512x640xbf16>, vector<4x640xf32> -> vector<4x640xf32>
    %c0_5 = arith.constant 0 : index
    %c0_6 = arith.constant 0 : index
    %c0_7 = arith.constant 0 : index
    %4 = vector.load %arg3[%c0_5, %c0_6, %c0_7] : memref<4x4x640xf32, #tpu.memory_space<vmem>>, vector<1x4x640xf32>
    %5 = vector.shape_cast %4 : vector<1x4x640xf32> to vector<4x640xf32>
    %6 = vector.extract_strided_slice %3 {offsets = [0, 0], sizes = [1, 640], strides = [1, 1]} : vector<4x640xf32> to vector<1x640xf32>
    %7 = vector.broadcast %6 : vector<1x640xf32> to vector<4x640xf32>
    %8 = arith.mulf %5, %7 : vector<4x640xf32>
    %c1 = arith.constant 1 : index
    %c0_8 = arith.constant 0 : index
    %c0_9 = arith.constant 0 : index
    %9 = vector.load %arg3[%c1, %c0_8, %c0_9] : memref<4x4x640xf32, #tpu.memory_space<vmem>>, vector<1x4x640xf32>
    %10 = vector.shape_cast %9 : vector<1x4x640xf32> to vector<4x640xf32>
    %11 = vector.extract_strided_slice %3 {offsets = [1, 0], sizes = [1, 640], strides = [1, 1]} : vector<4x640xf32> to vector<1x640xf32>
    %12 = vector.broadcast %11 : vector<1x640xf32> to vector<4x640xf32>
    %13 = arith.mulf %10, %12 : vector<4x640xf32>
    %14 = arith.addf %8, %13 : vector<4x640xf32>
    %c2 = arith.constant 2 : index
    %c0_10 = arith.constant 0 : index
    %c0_11 = arith.constant 0 : index
    %15 = vector.load %arg3[%c2, %c0_10, %c0_11] : memref<4x4x640xf32, #tpu.memory_space<vmem>>, vector<1x4x640xf32>
    %16 = vector.shape_cast %15 : vector<1x4x640xf32> to vector<4x640xf32>
    %17 = vector.extract_strided_slice %3 {offsets = [2, 0], sizes = [1, 640], strides = [1, 1]} : vector<4x640xf32> to vector<1x640xf32>
    %18 = vector.broadcast %17 : vector<1x640xf32> to vector<4x640xf32>
    %19 = arith.mulf %16, %18 : vector<4x640xf32>
    %20 = arith.addf %14, %19 : vector<4x640xf32>
    %c3 = arith.constant 3 : index
    %c0_12 = arith.constant 0 : index
    %c0_13 = arith.constant 0 : index
    %21 = vector.load %arg3[%c3, %c0_12, %c0_13] : memref<4x4x640xf32, #tpu.memory_space<vmem>>, vector<1x4x640xf32>
    %22 = vector.shape_cast %21 : vector<1x4x640xf32> to vector<4x640xf32>
    %23 = vector.extract_strided_slice %3 {offsets = [3, 0], sizes = [1, 640], strides = [1, 1]} : vector<4x640xf32> to vector<1x640xf32>
    %24 = vector.broadcast %23 : vector<1x640xf32> to vector<4x640xf32>
    %25 = arith.mulf %22, %24 : vector<4x640xf32>
    %26 = arith.addf %20, %25 : vector<4x640xf32>
    %27 = arith.truncf %26 : vector<4x640xf32> to vector<4x640xbf16>
    %c0_14 = arith.constant 0 : index
    %c0_15 = arith.constant 0 : index
    %28 = vector.load %arg4[%c0_14, %c0_15] : memref<640x256xbf16, #tpu.memory_space<vmem>>, vector<640x256xbf16>
    %cst_16 = arith.constant dense<0.000000e+00> : vector<4x256xf32>
    %29 = tpu.matmul %27, %28, %cst_16 {dimension_numbers = #tpu.dot_dimension_numbers<[1], [0], [0], [1], [0, 0, 1, 1], [], []>} : vector<4x640xbf16>, vector<640x256xbf16>, vector<4x256xf32> -> vector<4x256xf32>
    %c0_17 = arith.constant 0 : index
    %c0_18 = arith.constant 0 : index
    %30 = vector.load %arg5[%c0_17, %c0_18] : memref<4x256xf32, #tpu.memory_space<vmem>>, vector<4x256xf32>
    %31 = arith.addf %29, %30 : vector<4x256xf32>
    %32 = arith.truncf %31 : vector<4x256xf32> to vector<4x256xbf16>
    %c0_19 = arith.constant 0 : index
    %c0_20 = arith.constant 0 : index
    %33 = vector.load %arg6[%c0_19, %c0_20] : memref<256x128xbf16, #tpu.memory_space<vmem>>, vector<256x128xbf16>
    %cst_21 = arith.constant dense<0.000000e+00> : vector<4x128xf32>
    %34 = tpu.matmul %32, %33, %cst_21 {dimension_numbers = #tpu.dot_dimension_numbers<[1], [0], [0], [1], [0, 0, 1, 1], [], []>} : vector<4x256xbf16>, vector<256x128xbf16>, vector<4x128xf32> -> vector<4x128xf32>
    %c0_22 = arith.constant 0 : index
    %c0_23 = arith.constant 0 : index
    %35 = vector.load %arg7[%c0_22, %c0_23] : memref<1x128xf32, #tpu.memory_space<vmem>>, vector<1x128xf32>
    %36 = vector.broadcast %35 : vector<1x128xf32> to vector<4x128xf32>
    %37 = arith.addf %34, %36 : vector<4x128xf32>
    %38 = math.tanh %37 : vector<4x128xf32>
    %cst_24 = arith.constant dense<0.000000e+00> : vector<4xf32>
    %39 = vector.multi_reduction <add>, %38, %cst_24 [1] : vector<4x128xf32> to vector<4xf32>
    %40 = vector.shape_cast %39 : vector<4xf32> to vector<4x1xf32>
    %cst_25 = arith.constant 7.812500e-03 : f32
    %41 = vector.broadcast %cst_25 : f32 to vector<4x1xf32>
    %42 = arith.mulf %40, %41 : vector<4x1xf32>
    %43 = arith.mulf %38, %38 : vector<4x128xf32>
    %cst_26 = arith.constant dense<0.000000e+00> : vector<4xf32>
    %44 = vector.multi_reduction <add>, %43, %cst_26 [1] : vector<4x128xf32> to vector<4xf32>
    %45 = vector.shape_cast %44 : vector<4xf32> to vector<4x1xf32>
    %cst_27 = arith.constant 7.812500e-03 : f32
    %46 = vector.broadcast %cst_27 : f32 to vector<4x1xf32>
    %47 = arith.mulf %45, %46 : vector<4x1xf32>
    %48 = arith.mulf %42, %42 : vector<4x1xf32>
    %49 = arith.subf %47, %48 : vector<4x1xf32>
    %50 = vector.broadcast %42 : vector<4x1xf32> to vector<4x128xf32>
    %51 = arith.subf %38, %50 : vector<4x128xf32>
    %cst_28 = arith.constant 9.99999974E-6 : f32
    %52 = vector.broadcast %cst_28 : f32 to vector<4x1xf32>
    %53 = arith.addf %49, %52 : vector<4x1xf32>
    %54 = math.rsqrt %53 : vector<4x1xf32>
    %55 = vector.broadcast %54 : vector<4x1xf32> to vector<4x128xf32>
    %56 = arith.mulf %51, %55 : vector<4x128xf32>
    %c0_29 = arith.constant 0 : index
    %c0_30 = arith.constant 0 : index
    %57 = vector.load %arg8[%c0_29, %c0_30] : memref<1x128xf32, #tpu.memory_space<vmem>>, vector<1x128xf32>
    %58 = vector.broadcast %57 : vector<1x128xf32> to vector<4x128xf32>
    %59 = arith.mulf %56, %58 : vector<4x128xf32>
    %c0_31 = arith.constant 0 : index
    %c0_32 = arith.constant 0 : index
    %60 = vector.load %arg9[%c0_31, %c0_32] : memref<1x128xf32, #tpu.memory_space<vmem>>, vector<1x128xf32>
    %61 = vector.broadcast %60 : vector<1x128xf32> to vector<4x128xf32>
    %62 = arith.addf %59, %61 : vector<4x128xf32>
    %63 = vector.extract_strided_slice %0 {offsets = [0, 0], sizes = [4, 128], strides = [1, 1]} : vector<16x128xf32> to vector<4x128xf32>
    %64 = vector.extract_strided_slice %62 {offsets = [0, 0], sizes = [1, 128], strides = [1, 1]} : vector<4x128xf32> to vector<1x128xf32>
    %65 = vector.broadcast %64 : vector<1x128xf32> to vector<4x128xf32>
    %66 = arith.addf %63, %65 : vector<4x128xf32>
    %67 = vector.extract_strided_slice %0 {offsets = [4, 0], sizes = [4, 128], strides = [1, 1]} : vector<16x128xf32> to vector<4x128xf32>
    %68 = vector.extract_strided_slice %62 {offsets = [1, 0], sizes = [1, 128], strides = [1, 1]} : vector<4x128xf32> to vector<1x128xf32>
    %69 = vector.broadcast %68 : vector<1x128xf32> to vector<4x128xf32>
    %70 = arith.addf %67, %69 : vector<4x128xf32>
    %71 = vector.extract_strided_slice %0 {offsets = [8, 0], sizes = [4, 128], strides = [1, 1]} : vector<16x128xf32> to vector<4x128xf32>
    %72 = vector.extract_strided_slice %62 {offsets = [2, 0], sizes = [1, 128], strides = [1, 1]} : vector<4x128xf32> to vector<1x128xf32>
    %73 = vector.broadcast %72 : vector<1x128xf32> to vector<4x128xf32>
    %74 = arith.addf %71, %73 : vector<4x128xf32>
    %75 = vector.extract_strided_slice %0 {offsets = [12, 0], sizes = [4, 128], strides = [1, 1]} : vector<16x128xf32> to vector<4x128xf32>
    %76 = vector.extract_strided_slice %62 {offsets = [3, 0], sizes = [1, 128], strides = [1, 1]} : vector<4x128xf32> to vector<1x128xf32>
    %77 = vector.broadcast %76 : vector<1x128xf32> to vector<4x128xf32>
    %78 = arith.addf %75, %77 : vector<4x128xf32>
    %79 = tpu.concatenate %66, %70, %74, %78 in 0 : vector<4x128xf32>, vector<4x128xf32>, vector<4x128xf32>, vector<4x128xf32> -> vector<16x128xf32>
    %c0_33 = arith.constant 0 : index
    %c0_34 = arith.constant 0 : index
    %80 = vector.load %arg10[%c0_33, %c0_34] : memref<16x128xf32, #tpu.memory_space<vmem>>, vector<16x128xf32>
    tpu.vector_store %arg10[%c0_33, %c0_34], %79 {strides = array<i32>} : memref<16x128xf32, #tpu.memory_space<vmem>>, vector<16x128xf32>,
    return
  }
}

</mosaic_0001>

<bundles_post_ra>
// kernel: tpu_custom_call.1
= control target key start
LH: loop header
LB: loop body
LE: loop exit
PB: predicated region body
PF: predicated region fallthrough
CT: control target
= control target key end

     0   :  { %15 = vsyncpa [#allocation3], 0  ;;  %s3434_s0 = inlined_call_operand.hbm [shape: f32[16,128], index: 0, kind: input, shape index: {}, may-alias: {0,10}]   ;;  %s3435_s1 = inlined_call_operand.vmem [shape: bf16[4,512], index: 1, kind: input, shape index: {}]   ;;  %s3436_s2 = inlined_call_operand.hbm [shape: bf16[512,640], index: 2, kind: input, shape index: {}]   ;;  %s3437_s3 = inlined_call_operand.hbm [shape: f32[4,4,640], index: 3, kind: input, shape index: {}]   ;;  %s3438_s4 = inlined_call_operand.hbm [shape: bf16[640,256], index: 4, kind: input, shape index: {}]   ;;  %s3439_s5 = inlined_call_operand.vmem [shape: f32[4,256], index: 5, kind: input, shape index: {}]   ;;  %s3440_s6 = inlined_call_operand.hbm [shape: bf16[256,128], index: 6, kind: input, shape index: {}]   ;;  %s3441_s7 = inlined_call_operand.vmem [shape: f32[1,128], index: 7, kind: input, shape index: {}]   ;;  %s3442_s8 = inlined_call_operand.vmem [shape: f32[1,128], index: 8, kind: input, shape index: {}]   ;;  %s3443_s9 = inlined_call_operand.vmem [shape: f32[1,128], index: 9, kind: input, shape index: {}]   ;;  %s3444_s10 = inlined_call_operand.hbm [shape: f32[16,128], index: 10, kind: output, shape index: {}, may-alias: {0,10}]  }
   0x1   :  { %16 = vsyncpa [#allocation6], 0 }
   0x2   :  { %17 = vsyncpa [#allocation9], 0 }
   0x3   :  { %18 = vsyncpa [#allocation4], 0  ;;  %s3250_s13 = smov [#allocation5]  }
   0x4   :  { %s38_s14 = sshll.u32 %s3250_s13, 4  ;;  %s39_s14 = int_to_ptr.vmem [resolvable:$true] %s38_s14 }
   0x5   :  { %s3130_s15 = scalar_lea.vmem %s39_s14, 20480  ;;  %p3135_p1 = scmp.lt.s32.totalorder %s39_s14, %s39_s14 }
   0x6   :  { %p3131_p0 = scmp.ne.s32.totalorder %s39_s14, %s3130_s15  ;;  %p3136_p2 = scmp.lt.s32.totalorder %s3130_s15, %s3130_s15 }
   0x8   :  { %p3137_p3 = por %p3136_p2, %p3135_p1 }
   0xa   :  { %p3138_p4 = pnand %p3137_p3, %p3131_p0 }
   0xc   :  { %3141 = shalt.err (!%p3138_p4)
}
   0xd   :  { %s3251_s16 = smov 320   ;;  %s3252_s17 = smov 20  }
   0xe   :  { %44 = dma.hbm_to_vmem [thread:$0]  %s3436_s2, 20480, %s39_s14, [#allocation6], %s3251_s16, %s3251_s16, %s3252_s17  }
   0xf   :  { %s3253_s20 = smov [#allocation8]   ;;  %s3254_s22 = smov [#allocation2]  }
  0x10   :  { %s62_s21 = sshll.u32 %s3253_s20, 4  ;;  %s24_s23 = sshll.u32 %s3254_s22, 4  ;;  %s63_s21 = int_to_ptr.vmem [resolvable:$true] %s62_s21  ;;  %s25_s23 = int_to_ptr.vmem [resolvable:$true] %s24_s23 }
  0x11   :  { %s3150_s24 = scalar_lea.vmem %s63_s21, 10240  ;;  %p3155_p6 = scmp.lt.s32.totalorder %s63_s21, %s63_s21 }
  0x12   :  { %p3151_p5 = scmp.ne.s32.totalorder %s63_s21, %s3150_s24  ;;  %p3156_p7 = scmp.lt.s32.totalorder %s3150_s24, %s3150_s24 }
  0x14   :  { %p3157_p8 = por %p3156_p7, %p3155_p6 }
  0x16   :  { %p3158_p9 = pnand %p3157_p8, %p3151_p5 }
  0x18   :  { %3161 = shalt.err (!%p3158_p9)
}
  0x19   :  { %s3255_s25 = smov 128   ;;  %s3256_s26 = smov 8  }
  0x1a   :  { %68 = dma.hbm_to_vmem [thread:$0]  %s3438_s4, 10240, %s63_s21, [#allocation9], %s3255_s25, %s3255_s25, %s3256_s26  }
  0x1b   :  { %s3170_s2 = scalar_lea.vmem %s25_s23, 256  ;;  %p3175_p11 = scmp.lt.s32.totalorder %s25_s23, %s25_s23 }
  0x1c   :  { %p3171_p10 = scmp.ne.s32.totalorder %s25_s23, %s3170_s2  ;;  %p3176_p12 = scmp.lt.s32.totalorder %s3170_s2, %s3170_s2 }
  0x1e   :  { %p3177_p13 = por %p3176_p12, %p3175_p11 }
  0x20   :  { %p3178_p0 = pnand %p3177_p13, %p3171_p10 }
  0x22   :  { %3181 = shalt.err (!%p3178_p0)
}
  0x23   :  { %30 = dma.hbm_to_vmem [thread:$0]  %s3434_s0, 256, %s25_s23, [#allocation3], %s3255_s25, %s3255_s25, %s3256_s26  }
  0x24   :  { %s3257_s11 = smov [#allocation7]   ;;  %s3258_s13 = smov [#allocation10]  }
  0x25   :  { %s50_s12 = sshll.u32 %s3257_s11, 4  ;;  %s76_s4 = sshll.u32 %s3258_s13, 4  ;;  %s51_s12 = int_to_ptr.vmem [resolvable:$true] %s50_s12  ;;  %s77_s4 = int_to_ptr.vmem [resolvable:$true] %s76_s4 }
  0x26   :  { %s3190_s14 = scalar_lea.vmem %s51_s12, 1280  ;;  %p3195_p2 = scmp.lt.s32.totalorder %s51_s12, %s51_s12 }
  0x27   :  { %p3191_p1 = scmp.ne.s32.totalorder %s51_s12, %s3190_s14  ;;  %p3196_p3 = scmp.lt.s32.totalorder %s3190_s14, %s3190_s14 }
  0x29   :  { %p3197_p4 = por %p3196_p3, %p3195_p2 }
  0x2b   :  { %p3198_p5 = pnand %p3197_p4, %p3191_p1 }
  0x2d   :  { %3201 = shalt.err (!%p3198_p5)
}
  0x2e   :  { %56 = dma.hbm_to_vmem [thread:$0]  %s3437_s3, 1280, %s51_s12, [#allocation6], %s3251_s16, %s3251_s16, %s3252_s17  }
  0x2f   :  { %s3210_s0 = scalar_lea.vmem %s77_s4, 2048  ;;  %p3215_p7 = scmp.lt.s32.totalorder %s77_s4, %s77_s4 }
  0x30   :  { %p3211_p6 = scmp.ne.s32.totalorder %s77_s4, %s3210_s0  ;;  %p3216_p8 = scmp.lt.s32.totalorder %s3210_s0, %s3210_s0 }
  0x32   :  { %p3217_p9 = por %p3216_p8, %p3215_p7 }
  0x34   :  { %p3218_p10 = pnand %p3217_p9, %p3211_p6 }
  0x36   :  { %3221 = shalt.err (!%p3218_p10)
}
  0x37   :  { %s3259_s19 = smov 64   ;;  %s3260_s20 = smov 4  }
  0x38   :  { %82 = dma.hbm_to_vmem [thread:$0]  %s3440_s6, 2048, %s77_s4, [#allocation9], %s3259_s19, %s3259_s19, %s3260_s20  }
  0x39   :  { %3242 = dma.done.wait [#allocation3], 256  }
  0x3a   :  { %3243 = vsyncadd [#allocation3], 4294967040 }
  0x3b   :  { %3244 = dma.done.wait [#allocation6], 21760  }
  0x3c   :  { %3245 = vsyncadd [#allocation6], 4294945536 }
  0x3d   :  { %3246 = dma.done.wait [#allocation9], 12288  }
  0x3e   :  { %3247 = vsyncadd [#allocation9], 4294955008  ;;  %v2756_v0 = vld [vmem:[#allocation5 + $0x11c] ss:$20 sps:$4 sm:$0xff]   ;;  %v2760_v2 = vld [vmem:[#allocation5 + $0x118] ss:$20 sps:$4 sm:$0xff]   ;;  %v305_v38 = vlaneseq }
  0x3f   :  { %v2758_v1 = vld [vmem:[#allocation5 + $0x39c] ss:$20 sps:$4 sm:$0xff]   ;;  %1154 = vmatprep.subr.bf16.mxu0 %v2756_v0  ;;  %v2761_v3 = vld [vmem:[#allocation5 + $0x398] ss:$20 sps:$4 sm:$0xff]   ;;  %v2762_v4 = vld [vmem:[#allocation5 + $0xf4] ss:$20 sps:$4 sm:$0xff]  }
  0x40   :  { %1195 = vmatprep.subr.bf16.mxu1 %v2758_v1  ;;  %1155 = vmatpush1.bf16.msra.mxu0 %v2760_v2  ;;  %v2764_v5 = vld [vmem:[#allocation5 + $0x374] ss:$20 sps:$4 sm:$0xff]   ;;  %v2766_v6 = vld [vmem:[#allocation5 + $0xf0] ss:$20 sps:$4 sm:$0xff]   ;;  %v2768_v8 = vld [vmem:[#allocation5 + $0xcc] ss:$20 sps:$4 sm:$0xff]  }
  0x41   :  { %1196 = vmatpush1.bf16.msra.mxu1 %v2761_v3  ;;  %1156 = vmatprep.subr.bf16.mxu0 %v2762_v4  ;;  %v2767_v7 = vld [vmem:[#allocation5 + $0x370] ss:$20 sps:$4 sm:$0xff]   ;;  %v2770_v9 = vld [vmem:[#allocation5 + $0x34c] ss:$20 sps:$4 sm:$0xff]   ;;  %v2772_v10 = vld [vmem:[#allocation5 + $0xc8] ss:$20 sps:$4 sm:$0xff]  }
  0x42   :  { %1197 = vmatprep.subr.bf16.mxu1 %v2764_v5  ;;  %v2773_v11 = vld [vmem:[#allocation5 + $0x348] ss:$20 sps:$4 sm:$0xff]   ;;  %v2774_v12 = vld [vmem:[#allocation5 + $0xa4] ss:$20 sps:$4 sm:$0xff]   ;;  %v2778_v14 = vld [vmem:[#allocation5 + $0xa0] ss:$20 sps:$4 sm:$0xff]  }
  0x43   :  { %v2776_v13 = vld [vmem:[#allocation5 + $0x324] ss:$20 sps:$4 sm:$0xff]   ;;  %v2779_v15 = vld [vmem:[#allocation5 + $0x320] ss:$20 sps:$4 sm:$0xff]   ;;  %v2780_v16 = vld [vmem:[#allocation5 + $0x7c] ss:$20 sps:$4 sm:$0xff]  }
  0x44   :  { %1157 = vmatpush1.bf16.msra.mxu0 %v2766_v6  ;;  %v2782_v17 = vld [vmem:[#allocation5 + $0x2fc] ss:$20 sps:$4 sm:$0xff]   ;;  %v2784_v18 = vld [vmem:[#allocation5 + $0x78] ss:$20 sps:$4 sm:$0xff]   ;;  %v2786_v20 = vld [vmem:[#allocation5 + $0x54] ss:$20 sps:$4 sm:$0xff]  }
  0x45   :  { %1198 = vmatpush1.bf16.msra.mxu1 %v2767_v7  ;;  %1158 = vmatprep.subr.bf16.mxu0 %v2768_v8  ;;  %v2785_v19 = vld [vmem:[#allocation5 + $0x2f8] ss:$20 sps:$4 sm:$0xff]   ;;  %v2788_v21 = vld [vmem:[#allocation5 + $0x2d4] ss:$20 sps:$4 sm:$0xff]   ;;  %v2790_v22 = vld [vmem:[#allocation5 + $0x50] ss:$20 sps:$4 sm:$0xff]  }
  0x46   :  { %1199 = vmatprep.subr.bf16.mxu1 %v2770_v9  ;;  %v2791_v23 = vld [vmem:[#allocation5 + $0x2d0] ss:$20 sps:$4 sm:$0xff]   ;;  %v2792_v24 = vld [vmem:[#allocation5 + $0x2c] ss:$20 sps:$4 sm:$0xff]   ;;  %v2796_v26 = vld [vmem:[#allocation5 + $0x28] ss:$20 sps:$4 sm:$0xff]  }
  0x47   :  { %v2794_v25 = vld [vmem:[#allocation5 + $0x2ac] ss:$20 sps:$4 sm:$0xff]   ;;  %v2797_v27 = vld [vmem:[#allocation5 + $0x2a8] ss:$20 sps:$4 sm:$0xff]   ;;  %v2798_v28 = vld [vmem:[#allocation5 + $0x4] ss:$20 sps:$4 sm:$0xff]  }
  0x48   :  { %1159 = vmatpush1.bf16.msra.mxu0 %v2772_v10  ;;  %v2800_v29 = vld [vmem:[#allocation5 + $0x284] ss:$20 sps:$4 sm:$0xff]   ;;  %v2802_v30 = vld [vmem:[#allocation5] ss:$20 sps:$4 sm:$0xff]   ;;  %v2804_v32 = vld [vmem:[#allocation5 + $0x25c] ss:$20 sps:$4 sm:$0xff]  }
  0x49   :  { %1200 = vmatpush1.bf16.msra.mxu1 %v2773_v11  ;;  %1160 = vmatprep.subr.bf16.mxu0 %v2774_v12  ;;  %v2803_v31 = vld [vmem:[#allocation5 + $0x280] ss:$20 sps:$4 sm:$0xff]   ;;  %v2806_v33 = vld [vmem:[#allocation5 + $0x4dc] ss:$20 sps:$4 sm:$0xff]   ;;  %v2808_v34 = vld [vmem:[#allocation5 + $0x258] ss:$20 sps:$4 sm:$0xff]  }
  0x4a   :  { %1201 = vmatprep.subr.bf16.mxu1 %v2776_v13  ;;  %v2809_v35 = vld [vmem:[#allocation5 + $0x4d8] ss:$20 sps:$4 sm:$0xff]   ;;  %v3261_v36 = vmov 1983009808   ;;  %v2810_v39 = vld [vmem:[#allocation5 + $0x234] ss:$20 sps:$4 sm:$0xff]  }
  0x4b   :  { %v303_v37 = vunpack.c.l.s4 %v3261_v36  ;;  %v2812_v40 = vld [vmem:[#allocation5 + $0x4b4] ss:$20 sps:$4 sm:$0xff]   ;;  %v2814_v41 = vld [vmem:[#allocation5 + $0x230] ss:$20 sps:$4 sm:$0xff]   ;;  %v3346_v43 = vshrl.u32 %v305_v38, 7  ;;  %vm2342_vm0 = vcmask 1043456  }
  0x4c   :  { %1161 = vmatpush1.bf16.msra.mxu0 %v2778_v14  ;;  %v2815_v44 = vld [vmem:[#allocation5 + $0x4b0] ss:$20 sps:$4 sm:$0xff]   ;;  %v2816_v45 = vld [vmem:[#allocation5 + $0x20c] ss:$20 sps:$4 sm:$0xff]   ;;  %v2820_v47 = vld [vmem:[#allocation5 + $0x208] ss:$20 sps:$4 sm:$0xff]  }
  0x4d   :  { %1202 = vmatpush1.bf16.msra.mxu1 %v2779_v15  ;;  %1162 = vmatprep.subr.bf16.mxu0 %v2780_v16  ;;  %v304_v42 = vunpack.c.0.s8 %v303_v37  ;;  %v2818_v46 = vld [vmem:[#allocation5 + $0x48c] ss:$20 sps:$4 sm:$0xff]   ;;  %v2821_v48 = vld [vmem:[#allocation5 + $0x488] ss:$20 sps:$4 sm:$0xff]   ;;  %v2822_v50 = vld [vmem:[#allocation5 + $0x1e4] ss:$20 sps:$4 sm:$0xff]  }
  0x4e   :  { %1203 = vmatprep.subr.bf16.mxu1 %v2782_v17  ;;  %v2824_v51 = vld [vmem:[#allocation5 + $0x464] ss:$20 sps:$4 sm:$0xff]   ;;  %v107_v52 = vld [vmem:[%s3435_s1] sm:$0xff]  ;;  %v2840_v4 = vld [vmem:[#allocation5 + $0x16c] ss:$20 sps:$4 sm:$0xff]   ;;  %s3263_s28 = smov [#allocation11]  }
  0x4f   :  { %v307_v49 = vsub.s32 %v304_v42, %v3346_v43  ;;  %v2826_v53 = vld [vmem:[#allocation5 + $0x1e0] ss:$20 sps:$4 sm:$0xff]   ;;  %v301_v55 = vcombine.high %v107_v52, %v107_v52  ;;  %v2828_v57 = vld [vmem:[#allocation5 + $0x1bc] ss:$20 sps:$4 sm:$0xff]   ;;  %v2832_v61 = vld [vmem:[#allocation5 + $0x1b8] ss:$20 sps:$4 sm:$0xff]  }
  0x50   :  { %1163 = vmatpush1.bf16.msra.mxu0 %v2784_v18  ;;  %v2827_v56 = vld [vmem:[#allocation5 + $0x460] ss:$20 sps:$4 sm:$0xff]   ;;  %v2830_v58 = vld [vmem:[#allocation5 + $0x43c] ss:$20 sps:$4 sm:$0xff]   ;;  %v2833_v63 = vld [vmem:[#allocation5 + $0x438] ss:$20 sps:$4 sm:$0xff]  }
  0x51   :  { %1204 = vmatpush1.bf16.msra.mxu1 %v2785_v19  ;;  %1164 = vmatprep.subr.bf16.mxu0 %v2786_v20  ;;  %v3352_v54 = vrot.slane %v107_v52, %v307_v49  ;;  %v3358_v60 = vrot.slane %v301_v55, %v307_v49  ;;  %v2834_v0 = vld [vmem:[#allocation5 + $0x194] ss:$20 sps:$4 sm:$0xff]   ;;  %v2838_v2 = vld [vmem:[#allocation5 + $0x190] ss:$20 sps:$4 sm:$0xff]   ;;  %v2842_v5 = vld [vmem:[#allocation5 + $0x3ec] ss:$20 sps:$4 sm:$0xff]  }
  0x52   :  { %1205 = vmatprep.subr.bf16.mxu1 %v2788_v21  ;;  %v2836_v1 = vld [vmem:[#allocation5 + $0x414] ss:$20 sps:$4 sm:$0xff]   ;;  %v2839_v3 = vld [vmem:[#allocation5 + $0x410] ss:$20 sps:$4 sm:$0xff]   ;;  %v2859_v18 = vld [vmem:[#allocation5 + $0xf8] ss:$20 sps:$4 sm:$0xff]  }
  0x53   :  { %v3356_v59 = vcombine.high %v3352_v54, %v3352_v54  ;;  %v3363_v62 = vcombine.high %v3358_v60, %v3358_v60  ;;  %v2844_v6 = vld [vmem:[#allocation5 + $0x168] ss:$20 sps:$4 sm:$0xff]   ;;  %v2846_v8 = vld [vmem:[#allocation5 + $0x144] ss:$20 sps:$4 sm:$0xff]   ;;  %v2850_v10 = vld [vmem:[#allocation5 + $0x140] ss:$20 sps:$4 sm:$0xff]  }
  0x54   :  { %1165 = vmatpush1.bf16.msra.mxu0 %v2790_v22  ;;  %v2845_v7 = vld [vmem:[#allocation5 + $0x3e8] ss:$20 sps:$4 sm:$0xff]   ;;  %v2848_v9 = vld [vmem:[#allocation5 + $0x3c4] ss:$20 sps:$4 sm:$0xff]   ;;  %v2851_v11 = vld [vmem:[#allocation5 + $0x3c0] ss:$20 sps:$4 sm:$0xff]  }
  0x55   :  { %1206 = vmatpush1.bf16.msra.mxu1 %v2791_v23  ;;  %1166 = vmatprep.subr.bf16.mxu0 %v2792_v24  ;;  %v2855_v12 = vld [vmem:[#allocation5 + $0x124] ss:$20 sps:$4 sm:$0xff]   ;;  %v2853_v14 = vld [vmem:[#allocation5 + $0x120] ss:$20 sps:$4 sm:$0xff]   ;;  %v2861_v16 = vld [vmem:[#allocation5 + $0xfc] ss:$20 sps:$4 sm:$0xff]  }
  0x56   :  { %1207 = vmatprep.subr.bf16.mxu1 %v2794_v25  ;;  %1186 = vmatprep.mubr.bf16.mxu0 %v3356_v59  ;;  %v2858_v13 = vld [vmem:[#allocation5 + $0x3a4] ss:$20 sps:$4 sm:$0xff]   ;;  %v2856_v15 = vld [vmem:[#allocation5 + $0x3a0] ss:$20 sps:$4 sm:$0xff]   ;;  %v2864_v17 = vld [vmem:[#allocation5 + $0x37c] ss:$20 sps:$4 sm:$0xff]  }
  0x57   :  { %1227 = vmatprep.mubr.bf16.mxu1 %v3363_v62  ;;  %v2862_v19 = vld [vmem:[#allocation5 + $0x378] ss:$20 sps:$4 sm:$0xff]   ;;  %v2867_v20 = vld [vmem:[#allocation5 + $0xd4] ss:$20 sps:$4 sm:$0xff]   ;;  %v2865_v22 = vld [vmem:[#allocation5 + $0xd0] ss:$20 sps:$4 sm:$0xff]  }
  0x58   :  { %1167 = vmatpush1.bf16.msra.mxu0 %v2796_v26  ;;  %v2870_v21 = vld [vmem:[#allocation5 + $0x354] ss:$20 sps:$4 sm:$0xff]   ;;  %v2868_v23 = vld [vmem:[#allocation5 + $0x350] ss:$20 sps:$4 sm:$0xff]   ;;  %v2873_v24 = vld [vmem:[#allocation5 + $0xac] ss:$20 sps:$4 sm:$0xff]  }
  0x59   :  { %1208 = vmatpush1.bf16.msra.mxu1 %v2797_v27  ;;  %1168 = vmatprep.subr.bf16.mxu0 %v2798_v28  ;;  %v2876_v25 = vld [vmem:[#allocation5 + $0x32c] ss:$20 sps:$4 sm:$0xff]   ;;  %v2871_v26 = vld [vmem:[#allocation5 + $0xa8] ss:$20 sps:$4 sm:$0xff]   ;;  %v2879_v28 = vld [vmem:[#allocation5 + $0x84] ss:$20 sps:$4 sm:$0xff]  }
  0x5a   :  { %1209 = vmatprep.subr.bf16.mxu1 %v2800_v29  ;;  %v2874_v27 = vld [vmem:[#allocation5 + $0x328] ss:$20 sps:$4 sm:$0xff]   ;;  %v2882_v29 = vld [vmem:[#allocation5 + $0x304] ss:$20 sps:$4 sm:$0xff]   ;;  %s2403_s2 = sshll.u32 %s3263_s28, 4  ;;  %s2404_s2 = int_to_ptr.vmem [resolvable:$true] %s2403_s2 }
  0x5b   :  { %v2891_v36 = vld [vmem:[#allocation5 + $0x34] ss:$20 sps:$4 sm:$0xff]   ;;  %v2889_v38 = vld [vmem:[#allocation5 + $0x30] ss:$20 sps:$4 sm:$0xff]   ;;  %v2910_v52 = vld [vmem:[#allocation5 + $0x4b8] ss:$20 sps:$4 sm:$0xff]   ;;  %p3227_p12 = scmp.lt.s32.totalorder %s2404_s2, %s2404_s2 }
  0x5c   :  { %1169 = vmatpush1.bf16.msra.mxu0 %v2802_v30  ;;  %v2877_v30 = vld [vmem:[#allocation5 + $0x80] ss:$20 sps:$4 sm:$0xff]   ;;  %v2895_v42 = vld [vmem:[#allocation5 + $0x8] ss:$20 sps:$4 sm:$0xff]  }
  0x5d   :  { %1210 = vmatpush1.bf16.msra.mxu1 %v2803_v31  ;;  %1170 = vmatprep.subr.bf16.mxu0 %v2804_v32  ;;  %v2880_v31 = vld [vmem:[#allocation5 + $0x300] ss:$20 sps:$4 sm:$0xff]   ;;  %v2885_v32 = vld [vmem:[#allocation5 + $0x5c] ss:$20 sps:$4 sm:$0xff]  }
  0x5e   :  { %1211 = vmatprep.subr.bf16.mxu1 %v2806_v33  ;;  %v2888_v33 = vld [vmem:[#allocation5 + $0x2dc] ss:$20 sps:$4 sm:$0xff]   ;;  %v2894_v37 = vld [vmem:[#allocation5 + $0x2b4] ss:$20 sps:$4 sm:$0xff]  }
  0x5f   :  { %v2909_v49 = vld [vmem:[#allocation5 + $0x23c] ss:$20 sps:$4 sm:$0xff]   ;;  %v2918_v55 = vld [vmem:[#allocation5 + $0x494] ss:$20 sps:$4 sm:$0xff]  }
  0x60   :  { %1171 = vmatpush2.bf16.msra.mxu0 %v2808_v34  ;;  %v2883_v34 = vld [vmem:[#allocation5 + $0x58] ss:$20 sps:$4 sm:$0xff]  }
  0x61   :  { %1212 = vmatpush2.bf16.msra.mxu1 %v2809_v35  ;;  %1172 = vmatprep.subr.bf16.mxu0 %v2810_v39  ;;  %v2886_v35 = vld [vmem:[#allocation5 + $0x2d8] ss:$20 sps:$4 sm:$0xff]   ;;  %v2892_v39 = vld [vmem:[#allocation5 + $0x2b0] ss:$20 sps:$4 sm:$0xff]  }
  0x62   :  { %1213 = vmatprep.subr.bf16.mxu1 %v2812_v40  ;;  %v2897_v40 = vld [vmem:[#allocation5 + $0xc] ss:$20 sps:$4 sm:$0xff]  }
  0x64   :  { %1173 = vmatpush2.bf16.msra.mxu0 %v2814_v41  ;;  %v2900_v41 = vld [vmem:[#allocation5 + $0x28c] ss:$20 sps:$4 sm:$0xff]  }
  0x65   :  { %1214 = vmatpush2.bf16.msra.mxu1 %v2815_v44  ;;  %1174 = vmatprep.subr.bf16.mxu0 %v2816_v45  ;;  %v2898_v44 = vld [vmem:[#allocation5 + $0x288] ss:$20 sps:$4 sm:$0xff]   ;;  %v2903_v45 = vld [vmem:[#allocation5 + $0x264] ss:$20 sps:$4 sm:$0xff]  }
  0x66   :  { %1215 = vmatprep.subr.bf16.mxu1 %v2818_v46  ;;  %v2906_v46 = vld [vmem:[#allocation5 + $0x4e4] ss:$20 sps:$4 sm:$0xff]  }
  0x68   :  { %1175 = vmatpush2.bf16.msra.mxu0 %v2820_v47  ;;  %v2901_v47 = vld [vmem:[#allocation5 + $0x260] ss:$20 sps:$4 sm:$0xff]  }
  0x69   :  { %1216 = vmatpush2.bf16.msra.mxu1 %v2821_v48  ;;  %1176 = vmatprep.subr.bf16.mxu0 %v2822_v50  ;;  %v2904_v48 = vld [vmem:[#allocation5 + $0x4e0] ss:$20 sps:$4 sm:$0xff]   ;;  %v2912_v50 = vld [vmem:[#allocation5 + $0x4bc] ss:$20 sps:$4 sm:$0xff]  }
  0x6a   :  { %1217 = vmatprep.subr.bf16.mxu1 %v2824_v51  ;;  %v2907_v51 = vld [vmem:[#allocation5 + $0x238] ss:$20 sps:$4 sm:$0xff]  }
  0x6c   :  { %1177 = vmatpush2.bf16.msra.mxu0 %v2826_v53  ;;  %v2915_v53 = vld [vmem:[#allocation5 + $0x214] ss:$20 sps:$4 sm:$0xff]  }
  0x6d   :  { %1218 = vmatpush2.bf16.msra.mxu1 %v2827_v56  ;;  %1178 = vmatprep.subr.bf16.mxu0 %v2828_v57  ;;  %v2913_v56 = vld [vmem:[#allocation5 + $0x210] ss:$20 sps:$4 sm:$0xff]  }
  0x6e   :  { %1219 = vmatprep.subr.bf16.mxu1 %v2830_v58  ;;  %v2916_v57 = vld [vmem:[#allocation5 + $0x490] ss:$20 sps:$4 sm:$0xff]   ;;  %v2921_v58 = vld [vmem:[#allocation5 + $0x1ec] ss:$20 sps:$4 sm:$0xff]  }
  0x70   :  { %1179 = vmatpush2.bf16.msra.mxu0 %v2832_v61  ;;  %v2924_v61 = vld [vmem:[#allocation5 + $0x46c] ss:$20 sps:$4 sm:$0xff]  }
  0x71   :  { %1220 = vmatpush2.bf16.msra.mxu1 %v2833_v63  ;;  %1180 = vmatprep.subr.bf16.mxu0 %v2834_v0  ;;  %v2919_v63 = vld [vmem:[#allocation5 + $0x1e8] ss:$20 sps:$4 sm:$0xff]  }
  0x72   :  { %1221 = vmatprep.subr.bf16.mxu1 %v2836_v1  ;;  %v2922_v0 = vld [vmem:[#allocation5 + $0x468] ss:$20 sps:$4 sm:$0xff]   ;;  %v2927_v1 = vld [vmem:[#allocation5 + $0x1c4] ss:$20 sps:$4 sm:$0xff]  }
  0x74   :  { %1181 = vmatpush2.bf16.msra.mxu0 %v2838_v2  ;;  %v2930_v2 = vld [vmem:[#allocation5 + $0x444] ss:$20 sps:$4 sm:$0xff]  }
  0x75   :  { %1222 = vmatpush2.bf16.msra.mxu1 %v2839_v3  ;;  %1182 = vmatprep.subr.bf16.mxu0 %v2840_v4  ;;  %v2925_v3 = vld [vmem:[#allocation5 + $0x1c0] ss:$20 sps:$4 sm:$0xff]  }
  0x76   :  { %1223 = vmatprep.subr.bf16.mxu1 %v2842_v5  ;;  %v2928_v4 = vld [vmem:[#allocation5 + $0x440] ss:$20 sps:$4 sm:$0xff]   ;;  %v2933_v5 = vld [vmem:[#allocation5 + $0x19c] ss:$20 sps:$4 sm:$0xff]  }
  0x78   :  { %1183 = vmatpush2.bf16.msra.mxu0 %v2844_v6  ;;  %v2936_v6 = vld [vmem:[#allocation5 + $0x41c] ss:$20 sps:$4 sm:$0xff]  }
  0x79   :  { %1224 = vmatpush2.bf16.msra.mxu1 %v2845_v7  ;;  %1184 = vmatprep.subr.bf16.mxu0 %v2846_v8  ;;  %v2931_v7 = vld [vmem:[#allocation5 + $0x198] ss:$20 sps:$4 sm:$0xff]  }
  0x7a   :  { %1225 = vmatprep.subr.bf16.mxu1 %v2848_v9  ;;  %v2934_v8 = vld [vmem:[#allocation5 + $0x418] ss:$20 sps:$4 sm:$0xff]   ;;  %v2939_v9 = vld [vmem:[#allocation5 + $0x174] ss:$20 sps:$4 sm:$0xff]  }
  0x7c   :  { %1185 = vmatpush2.bf16.msra.mxu0 %v2850_v10  ;;  %v2942_v10 = vld [vmem:[#allocation5 + $0x3f4] ss:$20 sps:$4 sm:$0xff]  }
  0x7d   :  { %1226 = vmatpush2.bf16.msra.mxu1 %v2851_v11  ;;  %1236 = vmatprep.subr.bf16.mxu0 %v2855_v12  ;;  %v2937_v11 = vld [vmem:[#allocation5 + $0x170] ss:$20 sps:$4 sm:$0xff]  }
  0x7e   :  { %1277 = vmatprep.subr.bf16.mxu1 %v2858_v13  ;;  %v2940_v12 = vld [vmem:[#allocation5 + $0x3f0] ss:$20 sps:$4 sm:$0xff]   ;;  %v2945_v13 = vld [vmem:[#allocation5 + $0x14c] ss:$20 sps:$4 sm:$0xff]  }
  0x7f   :  { %1187 = vmatmul.mubr.bf16.vlgmr.msra.gmra.mxu0 %v3352_v54 }
  0x80   :  { %1228 = vmatmul.mubr.bf16.vlgmr.msra.gmra.mxu1 %v3358_v60  ;;  %1237 = vmatpush1.bf16.msra.mxu0 %v2853_v14  ;;  %v2948_v14 = vld [vmem:[#allocation5 + $0x3cc] ss:$20 sps:$4 sm:$0xff]  }
  0x81   :  { %1278 = vmatpush1.bf16.msra.mxu1 %v2856_v15  ;;  %1238 = vmatprep.subr.bf16.mxu0 %v2861_v16  ;;  %v2943_v15 = vld [vmem:[#allocation5 + $0x148] ss:$20 sps:$4 sm:$0xff]  }
  0x82   :  { %1279 = vmatprep.subr.bf16.mxu1 %v2864_v17  ;;  %1268 = vmatprep.mubr.bf16.mxu0 %v3356_v59  ;;  %v2946_v16 = vld [vmem:[#allocation5 + $0x3c8] ss:$20 sps:$4 sm:$0xff]  }
  0x83   :  { %1309 = vmatprep.mubr.bf16.mxu1 %v3363_v62  ;;  %v2949_v17 = vld [vmem:[#allocation5 + $0x268] ss:$20 sps:$4 sm:$0xff]  }
  0x84   :  { %1239 = vmatpush1.bf16.msra.mxu0 %v2859_v18  ;;  %v2950_v18 = vld [vmem:[#allocation5 + $0x4e8] ss:$20 sps:$4 sm:$0xff]  }
  0x85   :  { %1280 = vmatpush1.bf16.msra.mxu1 %v2862_v19  ;;  %1240 = vmatprep.subr.bf16.mxu0 %v2867_v20  ;;  %v2951_v19 = vld [vmem:[#allocation5 + $0x128] ss:$20 sps:$4 sm:$0xff]  }
  0x86   :  { %1281 = vmatprep.subr.bf16.mxu1 %v2870_v21  ;;  %v2952_v20 = vld [vmem:[#allocation5 + $0x3a8] ss:$20 sps:$4 sm:$0xff]   ;;  %v2953_v21 = vld [vmem:[#allocation5 + $0x240] ss:$20 sps:$4 sm:$0xff]  }
  0x88   :  { %1241 = vmatpush1.bf16.msra.mxu0 %v2865_v22  ;;  %v2954_v22 = vld [vmem:[#allocation5 + $0x4c0] ss:$20 sps:$4 sm:$0xff]  }
  0x89   :  { %1282 = vmatpush1.bf16.msra.mxu1 %v2868_v23  ;;  %1242 = vmatprep.subr.bf16.mxu0 %v2873_v24  ;;  %v2955_v23 = vld [vmem:[#allocation5 + $0x100] ss:$20 sps:$4 sm:$0xff]  }
  0x8a   :  { %1283 = vmatprep.subr.bf16.mxu1 %v2876_v25  ;;  %v2956_v24 = vld [vmem:[#allocation5 + $0x380] ss:$20 sps:$4 sm:$0xff]   ;;  %v2957_v25 = vld [vmem:[#allocation5 + $0x218] ss:$20 sps:$4 sm:$0xff]  }
  0x8c   :  { %1243 = vmatpush1.bf16.msra.mxu0 %v2871_v26  ;;  %v2958_v26 = vld [vmem:[#allocation5 + $0x498] ss:$20 sps:$4 sm:$0xff]  }
  0x8d   :  { %1284 = vmatpush1.bf16.msra.mxu1 %v2874_v27  ;;  %1244 = vmatprep.subr.bf16.mxu0 %v2879_v28  ;;  %v2959_v27 = vld [vmem:[#allocation5 + $0xd8] ss:$20 sps:$4 sm:$0xff]  }
  0x8e   :  { %1285 = vmatprep.subr.bf16.mxu1 %v2882_v29  ;;  %v2960_v28 = vld [vmem:[#allocation5 + $0x358] ss:$20 sps:$4 sm:$0xff]   ;;  %v2961_v29 = vld [vmem:[#allocation5 + $0x1f0] ss:$20 sps:$4 sm:$0xff]  }
  0x90   :  { %1245 = vmatpush1.bf16.msra.mxu0 %v2877_v30  ;;  %v2962_v30 = vld [vmem:[#allocation5 + $0x470] ss:$20 sps:$4 sm:$0xff]  }
  0x91   :  { %1286 = vmatpush1.bf16.msra.mxu1 %v2880_v31  ;;  %1246 = vmatprep.subr.bf16.mxu0 %v2885_v32  ;;  %v2963_v31 = vld [vmem:[#allocation5 + $0xb0] ss:$20 sps:$4 sm:$0xff]  }
  0x92   :  { %1287 = vmatprep.subr.bf16.mxu1 %v2888_v33  ;;  %v2964_v32 = vld [vmem:[#allocation5 + $0x330] ss:$20 sps:$4 sm:$0xff]   ;;  %v2965_v33 = vld [vmem:[#allocation5 + $0x1c8] ss:$20 sps:$4 sm:$0xff]  }
  0x94   :  { %1247 = vmatpush1.bf16.msra.mxu0 %v2883_v34  ;;  %v2966_v34 = vld [vmem:[#allocation5 + $0x448] ss:$20 sps:$4 sm:$0xff]  }
  0x95   :  { %1288 = vmatpush1.bf16.msra.mxu1 %v2886_v35  ;;  %1248 = vmatprep.subr.bf16.mxu0 %v2891_v36  ;;  %v2967_v35 = vld [vmem:[#allocation5 + $0x88] ss:$20 sps:$4 sm:$0xff]  }
  0x96   :  { %1289 = vmatprep.subr.bf16.mxu1 %v2894_v37  ;;  %v2968_v36 = vld [vmem:[#allocation5 + $0x308] ss:$20 sps:$4 sm:$0xff]   ;;  %v2969_v37 = vld [vmem:[#allocation5 + $0x1a0] ss:$20 sps:$4 sm:$0xff]  }
  0x98   :  { %1249 = vmatpush1.bf16.msra.mxu0 %v2889_v38  ;;  %v2972_v38 = vld [vmem:[#allocation5 + $0x2e0] ss:$20 sps:$4 sm:$0xff]  }
  0x99   :  { %1290 = vmatpush1.bf16.msra.mxu1 %v2892_v39  ;;  %1250 = vmatprep.subr.bf16.mxu0 %v2897_v40  ;;  %v2973_v39 = vld [vmem:[#allocation5 + $0x178] ss:$20 sps:$4 sm:$0xff]  }
  0x9a   :  { %1291 = vmatprep.subr.bf16.mxu1 %v2900_v41  ;;  %v2974_v40 = vld [vmem:[#allocation5 + $0x3f8] ss:$20 sps:$4 sm:$0xff]  }
  0x9b   :  { %v2975_v41 = vld [vmem:[#allocation5 + $0x38] ss:$20 sps:$4 sm:$0xff]  }
  0x9c   :  { %1251 = vmatpush1.bf16.msra.mxu0 %v2895_v42  ;;  %v2976_v42 = vld [vmem:[#allocation5 + $0x2b8] ss:$20 sps:$4 sm:$0xff]  }
  0x9d   :  { %1292 = vmatpush1.bf16.msra.mxu1 %v2898_v44  ;;  %1252 = vmatprep.subr.bf16.mxu0 %v2903_v45  ;;  %v2977_v44 = vld [vmem:[#allocation5 + $0x150] ss:$20 sps:$4 sm:$0xff]  }
  0x9e   :  { %1293 = vmatprep.subr.bf16.mxu1 %v2906_v46  ;;  %v2978_v45 = vld [vmem:[#allocation5 + $0x3d0] ss:$20 sps:$4 sm:$0xff]  }
  0x9f   :  { %v2979_v46 = vld [vmem:[#allocation5 + $0x10] ss:$20 sps:$4 sm:$0xff]  }
  0xa0   :  { %1253 = vmatpush2.bf16.msra.mxu0 %v2901_v47  ;;  %v2980_v47 = vld [vmem:[#allocation5 + $0x290] ss:$20 sps:$4 sm:$0xff]  }
  0xa1   :  { %1294 = vmatpush2.bf16.msra.mxu1 %v2904_v48  ;;  %1254 = vmatprep.subr.bf16.mxu0 %v2909_v49  ;;  %v2983_v48 = vld [vmem:[#allocation8 + $0x74] ss:$8 sps:$4 sm:$0xff]  }
  0xa2   :  { %1295 = vmatprep.subr.bf16.mxu1 %v2912_v50  ;;  %v3031_v49 = vld [vmem:[#allocation8 + $0x174] ss:$8 sps:$4 sm:$0xff]   ;;  %v2981_v50 = vld [vmem:[#allocation8 + $0x70] ss:$8 sps:$4 sm:$0xff]  }
  0xa4   :  { %1255 = vmatpush2.bf16.msra.mxu0 %v2907_v51  ;;  %v2986_v51 = vld [vmem:[#allocation8 + $0x64] ss:$8 sps:$4 sm:$0xff]  }
  0xa5   :  { %1296 = vmatpush2.bf16.msra.mxu1 %v2910_v52  ;;  %1256 = vmatprep.subr.bf16.mxu0 %v2915_v53  ;;  %v3029_v52 = vld [vmem:[#allocation8 + $0x170] ss:$8 sps:$4 sm:$0xff]   ;;  %v3034_v53 = vld [vmem:[#allocation8 + $0x164] ss:$8 sps:$4 sm:$0xff]  }
  0xa6   :  { %1297 = vmatprep.subr.bf16.mxu1 %v2918_v55  ;;  %v2984_v55 = vld [vmem:[#allocation8 + $0x60] ss:$8 sps:$4 sm:$0xff]  }
  0xa8   :  { %1257 = vmatpush2.bf16.msra.mxu0 %v2913_v56  ;;  %v3032_v56 = vld [vmem:[#allocation8 + $0x160] ss:$8 sps:$4 sm:$0xff]  }
  0xa9   :  { %1298 = vmatpush2.bf16.msra.mxu1 %v2916_v57  ;;  %1258 = vmatprep.subr.bf16.mxu0 %v2921_v58  ;;  %v2989_v57 = vld [vmem:[#allocation8 + $0x54] ss:$8 sps:$4 sm:$0xff]  }
  0xaa   :  { %1299 = vmatprep.subr.bf16.mxu1 %v2924_v61  ;;  %v3037_v58 = vld [vmem:[#allocation8 + $0x154] ss:$8 sps:$4 sm:$0xff]   ;;  %v2987_v61 = vld [vmem:[#allocation8 + $0x50] ss:$8 sps:$4 sm:$0xff]  }
  0xac   :  { %1259 = vmatpush2.bf16.msra.mxu0 %v2919_v63  ;;  %v3035_v63 = vld [vmem:[#allocation8 + $0x150] ss:$8 sps:$4 sm:$0xff]  }
  0xad   :  { %1300 = vmatpush2.bf16.msra.mxu1 %v2922_v0  ;;  %1260 = vmatprep.subr.bf16.mxu0 %v2927_v1  ;;  %v2992_v0 = vld [vmem:[#allocation8 + $0x44] ss:$8 sps:$4 sm:$0xff]  }
  0xae   :  { %1301 = vmatprep.subr.bf16.mxu1 %v2930_v2  ;;  %v3040_v1 = vld [vmem:[#allocation8 + $0x144] ss:$8 sps:$4 sm:$0xff]   ;;  %v2990_v2 = vld [vmem:[#allocation8 + $0x40] ss:$8 sps:$4 sm:$0xff]  }
  0xb0   :  { %1261 = vmatpush2.bf16.msra.mxu0 %v2925_v3  ;;  %v3038_v3 = vld [vmem:[#allocation8 + $0x140] ss:$8 sps:$4 sm:$0xff]  }
  0xb1   :  { %1302 = vmatpush2.bf16.msra.mxu1 %v2928_v4  ;;  %1262 = vmatprep.subr.bf16.mxu0 %v2933_v5  ;;  %v2995_v4 = vld [vmem:[#allocation8 + $0x34] ss:$8 sps:$4 sm:$0xff]   ;;  %v3041_v5 = vld [vmem:[#allocation8 + $0x130] ss:$8 sps:$4 sm:$0xff]  }
  0xb2   :  { %1303 = vmatprep.subr.bf16.mxu1 %v2936_v6  ;;  %v2998_v6 = vld [vmem:[#allocation8 + $0x24] ss:$8 sps:$4 sm:$0xff]  }
  0xb4   :  { %1263 = vmatpush2.bf16.msra.mxu0 %v2931_v7  ;;  %v3046_v7 = vld [vmem:[#allocation8 + $0x124] ss:$8 sps:$4 sm:$0xff]  }
  0xb5   :  { %1304 = vmatpush2.bf16.msra.mxu1 %v2934_v8  ;;  %1264 = vmatprep.subr.bf16.mxu0 %v2939_v9  ;;  %v2996_v8 = vld [vmem:[#allocation8 + $0x20] ss:$8 sps:$4 sm:$0xff]  }
  0xb6   :  { %1305 = vmatprep.subr.bf16.mxu1 %v2942_v10  ;;  %v3044_v9 = vld [vmem:[#allocation8 + $0x120] ss:$8 sps:$4 sm:$0xff]   ;;  %v3001_v10 = vld [vmem:[#allocation8 + $0x14] ss:$8 sps:$4 sm:$0xff]  }
  0xb8   :  { %1265 = vmatpush2.bf16.msra.mxu0 %v2937_v11  ;;  %v3049_v11 = vld [vmem:[#allocation8 + $0x114] ss:$8 sps:$4 sm:$0xff]  }
  0xb9   :  { %1306 = vmatpush2.bf16.msra.mxu1 %v2940_v12  ;;  %1266 = vmatprep.subr.bf16.mxu0 %v2945_v13  ;;  %v2999_v12 = vld [vmem:[#allocation8 + $0x10] ss:$8 sps:$4 sm:$0xff]  }
  0xba   :  { %1307 = vmatprep.subr.bf16.mxu1 %v2948_v14  ;;  %v3047_v13 = vld [vmem:[#allocation8 + $0x110] ss:$8 sps:$4 sm:$0xff]   ;;  %v3004_v14 = vld [vmem:[#allocation8 + $0x4] ss:$8 sps:$4 sm:$0xff]  }
  0xbc   :  { %1267 = vmatpush2.bf16.msra.mxu0 %v2943_v15  ;;  %v3052_v15 = vld [vmem:[#allocation8 + $0x104] ss:$8 sps:$4 sm:$0xff]  }
  0xbd   :  { %1308 = vmatpush2.bf16.msra.mxu1 %v2946_v16  ;;  %2676 = vmatprep.subr.bf16.mxu0 %v2949_v17  ;;  %v3002_v16 = vld [vmem:[#allocation8] ss:$8 sps:$4 sm:$0xff]  }
  0xbe   :  { %2698 = vmatprep.subr.bf16.mxu1 %v2950_v18  ;;  %v3050_v17 = vld [vmem:[#allocation8 + $0x100] ss:$8 sps:$4 sm:$0xff]   ;;  %v3007_v18 = vld [vmem:[#allocation8 + $0xf4] ss:$8 sps:$4 sm:$0xff]  }
  0xbf   :  { %1269 = vmatmul.mubr.bf16.vlgmr.msra.gmra.mxu0 %v3352_v54 }
  0xc0   :  { %1310 = vmatmul.mubr.bf16.vlgmr.msra.gmra.mxu1 %v3358_v60  ;;  %2677 = vmatpush3.bf16.msra.mxu0 %v2951_v19  ;;  %v3055_v19 = vld [vmem:[#allocation8 + $0x1f4] ss:$8 sps:$4 sm:$0xff]  }
  0xc1   :  { %2699 = vmatpush3.bf16.msra.mxu1 %v2952_v20  ;;  %2678 = vmatprep.subr.bf16.mxu0 %v2953_v21  ;;  %v3005_v20 = vld [vmem:[#allocation8 + $0xf0] ss:$8 sps:$4 sm:$0xff]  }
  0xc2   :  { %2700 = vmatprep.subr.bf16.mxu1 %v2954_v22  ;;  %1350 = vmatprep.mubr.bf16.mxu0 %v3356_v59  ;;  %v2970_v59 = vld [vmem:[#allocation5 + $0x420] ss:$20 sps:$4 sm:$0xff]  }
  0xc3   :  { %1390 = vmatprep.mubr.bf16.mxu1 %v3363_v62  ;;  %v2971_v62 = vld [vmem:[#allocation5 + $0x60] ss:$20 sps:$4 sm:$0xff]  }
  0xc4   :  { %2679 = vmatpush3.bf16.msra.mxu0 %v2955_v23  ;;  %v3053_v21 = vld [vmem:[#allocation8 + $0x1f0] ss:$8 sps:$4 sm:$0xff]   ;;  %v3010_v22 = vld [vmem:[#allocation8 + $0xe4] ss:$8 sps:$4 sm:$0xff]  }
  0xc5   :  { %2701 = vmatpush3.bf16.msra.mxu1 %v2956_v24  ;;  %2680 = vmatprep.subr.bf16.mxu0 %v2957_v25  ;;  %v3058_v23 = vld [vmem:[#allocation8 + $0x1e4] ss:$8 sps:$4 sm:$0xff]   ;;  %v3008_v24 = vld [vmem:[#allocation8 + $0xe0] ss:$8 sps:$4 sm:$0xff]  }
  0xc6   :  { %2702 = vmatprep.subr.bf16.mxu1 %v2958_v26  ;;  %v3056_v25 = vld [vmem:[#allocation8 + $0x1e0] ss:$8 sps:$4 sm:$0xff]   ;;  %v3013_v26 = vld [vmem:[#allocation8 + $0xd4] ss:$8 sps:$4 sm:$0xff]  }
  0xc8   :  { %2681 = vmatpush3.bf16.msra.mxu0 %v2959_v27  ;;  %v3061_v27 = vld [vmem:[#allocation8 + $0x1d4] ss:$8 sps:$4 sm:$0xff]  }
  0xc9   :  { %2703 = vmatpush3.bf16.msra.mxu1 %v2960_v28  ;;  %2682 = vmatprep.subr.bf16.mxu0 %v2961_v29  ;;  %v3011_v28 = vld [vmem:[#allocation8 + $0xd0] ss:$8 sps:$4 sm:$0xff]  }
  0xca   :  { %2704 = vmatprep.subr.bf16.mxu1 %v2962_v30  ;;  %v3059_v29 = vld [vmem:[#allocation8 + $0x1d0] ss:$8 sps:$4 sm:$0xff]   ;;  %v3016_v30 = vld [vmem:[#allocation8 + $0xc4] ss:$8 sps:$4 sm:$0xff]  }
  0xcc   :  { %2683 = vmatpush3.bf16.msra.mxu0 %v2963_v31  ;;  %v3064_v31 = vld [vmem:[#allocation8 + $0x1c4] ss:$8 sps:$4 sm:$0xff]  }
  0xcd   :  { %2705 = vmatpush3.bf16.msra.mxu1 %v2964_v32  ;;  %2684 = vmatprep.subr.bf16.mxu0 %v2965_v33  ;;  %v3014_v32 = vld [vmem:[#allocation8 + $0xc0] ss:$8 sps:$4 sm:$0xff]  }
  0xce   :  { %2706 = vmatprep.subr.bf16.mxu1 %v2966_v34  ;;  %v3062_v33 = vld [vmem:[#allocation8 + $0x1c0] ss:$8 sps:$4 sm:$0xff]   ;;  %v3019_v34 = vld [vmem:[#allocation8 + $0xb4] ss:$8 sps:$4 sm:$0xff]  }
  0xd0   :  { %2685 = vmatpush3.bf16.msra.mxu0 %v2967_v35  ;;  %v3067_v35 = vld [vmem:[#allocation8 + $0x1b4] ss:$8 sps:$4 sm:$0xff]  }
  0xd1   :  { %2707 = vmatpush3.bf16.msra.mxu1 %v2968_v36  ;;  %2686 = vmatprep.subr.bf16.mxu0 %v2969_v37  ;;  %v3017_v36 = vld [vmem:[#allocation8 + $0xb0] ss:$8 sps:$4 sm:$0xff]  }
  0xd2   :  { %2708 = vmatprep.subr.bf16.mxu1 %v2970_v59  ;;  %v3065_v37 = vld [vmem:[#allocation8 + $0x1b0] ss:$8 sps:$4 sm:$0xff]   ;;  %v3022_v59 = vld [vmem:[#allocation8 + $0xa4] ss:$8 sps:$4 sm:$0xff]  }
  0xd4   :  { %2687 = vmatpush3.bf16.msra.mxu0 %v2971_v62  ;;  %v3070_v62 = vld [vmem:[#allocation8 + $0x1a4] ss:$8 sps:$4 sm:$0xff]  }
  0xd5   :  { %2709 = vmatpush3.bf16.msra.mxu1 %v2972_v38  ;;  %2688 = vmatprep.subr.bf16.mxu0 %v2973_v39  ;;  %v3020_v38 = vld [vmem:[#allocation8 + $0xa0] ss:$8 sps:$4 sm:$0xff]  }
  0xd6   :  { %2710 = vmatprep.subr.bf16.mxu1 %v2974_v40  ;;  %v3068_v39 = vld [vmem:[#allocation8 + $0x1a0] ss:$8 sps:$4 sm:$0xff]   ;;  %v3025_v40 = vld [vmem:[#allocation8 + $0x94] ss:$8 sps:$4 sm:$0xff]  }
  0xd8   :  { %2689 = vmatpush3.bf16.msra.mxu0 %v2975_v41  ;;  %v3073_v41 = vld [vmem:[#allocation8 + $0x194] ss:$8 sps:$4 sm:$0xff]  }
  0xd9   :  { %2711 = vmatpush3.bf16.msra.mxu1 %v2976_v42  ;;  %2690 = vmatprep.subr.bf16.mxu0 %v2977_v44  ;;  %v3023_v42 = vld [vmem:[#allocation8 + $0x90] ss:$8 sps:$4 sm:$0xff]  }
  0xda   :  { %2712 = vmatprep.subr.bf16.mxu1 %v2978_v45  ;;  %v3071_v44 = vld [vmem:[#allocation8 + $0x190] ss:$8 sps:$4 sm:$0xff]   ;;  %v3028_v45 = vld [vmem:[#allocation8 + $0x84] ss:$8 sps:$4 sm:$0xff]  }
  0xdc   :  { %2691 = vmatpush3.bf16.msra.mxu0 %v2979_v46  ;;  %v3076_v46 = vld [vmem:[#allocation8 + $0x184] ss:$8 sps:$4 sm:$0xff]  }
  0xdd   :  { %2713 = vmatpush3.bf16.msra.mxu1 %v2980_v47  ;;  %2041 = vmatprep.subr.bf16.mxu0 %v2983_v48  ;;  %v3026_v47 = vld [vmem:[#allocation8 + $0x80] ss:$8 sps:$4 sm:$0xff]  }
  0xde   :  { %2082 = vmatprep.subr.bf16.mxu1 %v3031_v49  ;;  %v3074_v48 = vld [vmem:[#allocation8 + $0x180] ss:$8 sps:$4 sm:$0xff]   ;;  %v3079_v49 = vld [vmem:[#allocation8 + $0x274] ss:$8 sps:$4 sm:$0xff]  }
  0xdf   :  { %1351 = vmatmul.mubr.bf16.vlgmr.msra.gmra.mxu0 %v3352_v54  ;;  %v3043_v54 = vld [vmem:[#allocation8 + $0x134] ss:$8 sps:$4 sm:$0xff]  }
  0xe0   :  { %1391 = vmatmul.mubr.bf16.vlgmr.msra.gmra.mxu1 %v3358_v60  ;;  %2042 = vmatpush1.bf16.msra.mxu0 %v2981_v50  ;;  %v2993_v60 = vld [vmem:[#allocation8 + $0x30] ss:$8 sps:$4 sm:$0xff]  }
  0xe1   :  { %2083 = vmatpush1.bf16.msra.mxu1 %v3029_v52  ;;  %2043 = vmatprep.subr.bf16.mxu0 %v2986_v51  ;;  %v3377_v52 = vsub.s32 0, %v3346_v43 }
  0xe2   :  { %2084 = vmatprep.subr.bf16.mxu1 %v3034_v53  ;;  %v3380_v53 = vsub.s32 1, %v3346_v43 }
  0xe4   :  { %2044 = vmatpush1.bf16.msra.mxu0 %v2984_v55  ;;  %v3383_v55 = vsub.s32 2, %v3346_v43 }
  0xe5   :  { %2085 = vmatpush1.bf16.msra.mxu1 %v3032_v56  ;;  %2045 = vmatprep.subr.bf16.mxu0 %v2989_v57  ;;  %v3386_v57 = vsub.s32 3, %v3346_v43 }
  0xe6   :  { %2086 = vmatprep.subr.bf16.mxu1 %v3037_v58 }
  0xe8   :  { %2046 = vmatpush1.bf16.msra.mxu0 %v2987_v61 }
  0xe9   :  { %2087 = vmatpush1.bf16.msra.mxu1 %v3035_v63  ;;  %2047 = vmatprep.subr.bf16.mxu0 %v2992_v0 }
  0xea   :  { %2088 = vmatprep.subr.bf16.mxu1 %v3040_v1 }
  0xec   :  { %2048 = vmatpush1.bf16.msra.mxu0 %v2990_v2 }
  0xed   :  { %2089 = vmatpush1.bf16.msra.mxu1 %v3038_v3  ;;  %2049 = vmatprep.subr.bf16.mxu0 %v2995_v4 }
  0xee   :  { %2090 = vmatprep.subr.bf16.mxu1 %v3043_v54 }
  0xf0   :  { %2050 = vmatpush1.bf16.msra.mxu0 %v2993_v60 }
  0xf1   :  { %2091 = vmatpush1.bf16.msra.mxu1 %v3041_v5  ;;  %2051 = vmatprep.subr.bf16.mxu0 %v2998_v6 }
  0xf2   :  { %2092 = vmatprep.subr.bf16.mxu1 %v3046_v7 }
  0xf4   :  { %2052 = vmatpush1.bf16.msra.mxu0 %v2996_v8 }
  0xf5   :  { %2093 = vmatpush1.bf16.msra.mxu1 %v3044_v9  ;;  %2053 = vmatprep.subr.bf16.mxu0 %v3001_v10  ;;  %v1398_v9 = vld [vmem:[#allocation7] sm:$0xff]  ;;  %v1433_v10 = vld [vmem:[#allocation7 + $0x14] sm:$0xff] }
  0xf6   :  { %2094 = vmatprep.subr.bf16.mxu1 %v3049_v11 }
  0xf8   :  { %2054 = vmatpush1.bf16.msra.mxu0 %v2999_v12 }
  0xf9   :  { %2095 = vmatpush1.bf16.msra.mxu1 %v3047_v13  ;;  %2055 = vmatprep.subr.bf16.mxu0 %v3004_v14  ;;  %v1471_v14 = vld [vmem:[#allocation7 + $0x28] sm:$0xff] }
  0xfa   :  { %2096 = vmatprep.subr.bf16.mxu1 %v3052_v15 }
  0xfc   :  { %2056 = vmatpush1.bf16.msra.mxu0 %v3002_v16 }
  0xfd   :  { %2097 = vmatpush1.bf16.msra.mxu1 %v3050_v17  ;;  %2057 = vmatprep.subr.bf16.mxu0 %v3007_v18  ;;  %v1509_v18 = vld [vmem:[#allocation7 + $0x3c] sm:$0xff] }
  0xfe   :  { %2098 = vmatprep.subr.bf16.mxu1 %v3055_v19 }
 0x100   :  { %2058 = vmatpush2.bf16.msra.mxu0 %v3005_v20 }
 0x101   :  { %2099 = vmatpush2.bf16.msra.mxu1 %v3053_v21  ;;  %2059 = vmatprep.subr.bf16.mxu0 %v3010_v22 }
 0x102   :  { %2100 = vmatprep.subr.bf16.mxu1 %v3058_v23 }
 0x104   :  { %2060 = vmatpush2.bf16.msra.mxu0 %v3008_v24 }
 0x105   :  { %2101 = vmatpush2.bf16.msra.mxu1 %v3056_v25  ;;  %2061 = vmatprep.subr.bf16.mxu0 %v3013_v26  ;;  %v3077_v26 = vld [vmem:[#allocation8 + $0x270] ss:$8 sps:$4 sm:$0xff]  }
 0x106   :  { %2102 = vmatprep.subr.bf16.mxu1 %v3061_v27 }
 0x108   :  { %2062 = vmatpush2.bf16.msra.mxu0 %v3011_v28  ;;  %v3082_v28 = vld [vmem:[#allocation8 + $0x264] ss:$8 sps:$4 sm:$0xff]  }
 0x109   :  { %2103 = vmatpush2.bf16.msra.mxu1 %v3059_v29  ;;  %2063 = vmatprep.subr.bf16.mxu0 %v3016_v30  ;;  %v3080_v29 = vld [vmem:[#allocation8 + $0x260] ss:$8 sps:$4 sm:$0xff]   ;;  %v3262_v30 = vmov 0  }
 0x10a   :  { %2104 = vmatprep.subr.bf16.mxu1 %v3064_v31  ;;  %v3085_v31 = vld [vmem:[#allocation8 + $0x254] ss:$8 sps:$4 sm:$0xff]  }
 0x10c   :  { %2064 = vmatpush2.bf16.msra.mxu0 %v3014_v32  ;;  %v3083_v32 = vld [vmem:[#allocation8 + $0x250] ss:$8 sps:$4 sm:$0xff]  }
 0x10d   :  { %2105 = vmatpush2.bf16.msra.mxu1 %v3062_v33  ;;  %2065 = vmatprep.subr.bf16.mxu0 %v3019_v34  ;;  %v3088_v33 = vld [vmem:[#allocation8 + $0x244] ss:$8 sps:$4 sm:$0xff]   ;;  %v3086_v34 = vld [vmem:[#allocation8 + $0x240] ss:$8 sps:$4 sm:$0xff]  }
 0x10e   :  { %2106 = vmatprep.subr.bf16.mxu1 %v3067_v35  ;;  %v3091_v35 = vld [vmem:[#allocation8 + $0x234] ss:$8 sps:$4 sm:$0xff]  }
 0x110   :  { %2066 = vmatpush2.bf16.msra.mxu0 %v3017_v36  ;;  %v3089_v36 = vld [vmem:[#allocation8 + $0x230] ss:$8 sps:$4 sm:$0xff]  }
 0x111   :  { %2107 = vmatpush2.bf16.msra.mxu1 %v3065_v37  ;;  %2067 = vmatprep.subr.bf16.mxu0 %v3022_v59  ;;  %v3094_v37 = vld [vmem:[#allocation8 + $0x224] ss:$8 sps:$4 sm:$0xff]   ;;  %v3092_v59 = vld [vmem:[#allocation8 + $0x220] ss:$8 sps:$4 sm:$0xff]  }
 0x112   :  { %2108 = vmatprep.subr.bf16.mxu1 %v3070_v62  ;;  %v3097_v62 = vld [vmem:[#allocation8 + $0x214] ss:$8 sps:$4 sm:$0xff]  }
 0x114   :  { %2068 = vmatpush2.bf16.msra.mxu0 %v3020_v38  ;;  %v3095_v38 = vld [vmem:[#allocation8 + $0x210] ss:$8 sps:$4 sm:$0xff]  }
 0x115   :  { %2109 = vmatpush2.bf16.msra.mxu1 %v3068_v39  ;;  %2069 = vmatprep.subr.bf16.mxu0 %v3025_v40  ;;  %v3100_v39 = vld [vmem:[#allocation8 + $0x204] ss:$8 sps:$4 sm:$0xff]   ;;  %v3098_v40 = vld [vmem:[#allocation8 + $0x200] ss:$8 sps:$4 sm:$0xff]  }
 0x116   :  { %2110 = vmatprep.subr.bf16.mxu1 %v3073_v41 }
 0x118   :  { %2070 = vmatpush2.bf16.msra.mxu0 %v3023_v42 }
 0x119   :  { %2111 = vmatpush2.bf16.msra.mxu1 %v3071_v44  ;;  %2071 = vmatprep.subr.bf16.mxu0 %v3028_v45 }
 0x11a   :  { %2112 = vmatprep.subr.bf16.mxu1 %v3076_v46 }
 0x11c   :  { %2072 = vmatpush2.bf16.msra.mxu0 %v3026_v47 }
 0x11d   :  { %2113 = vmatpush2.bf16.msra.mxu1 %v3074_v48  ;;  %2123 = vmatprep.subr.bf16.mxu0 %v3079_v49 }
 0x13f   :  { %v1188_v50 = vpop.f32.mrf.mxu0 }
 0x140   :  { %v1229_v51 = vpop.f32.mrf.mxu1 }
 0x141   :  { %v1230_v56 = vadd.f32 %v1229_v51, %v1188_v50  ;;  %v1190_v58 = vpop.f32.mrf.mxu0 }
 0x142   :  { %v1231_v61 = vpop.f32.mrf.mxu1 }
 0x143   :  { %v1404_v63 = vrot.slane %v1230_v56, %v3377_v52  ;;  %v1439_v0 = vrot.slane %v1230_v56, %v3380_v53  ;;  %v1477_v1 = vrot.slane %v1230_v56, %v3383_v55  ;;  %v1232_v2 = vadd.f32 %v1231_v61, %v1190_v58  ;;  %v1192_v3 = vpop.f32.mrf.mxu0 }
 0x144   :  { %v1233_v4 = vpop.f32.mrf.mxu1  ;;  %v1515_v54 = vrot.slane %v1230_v56, %v3386_v57 }
 0x145   :  { %v1408_v60 = vrot.slane %v1232_v2, %v3377_v52  ;;  %v1443_v5 = vrot.slane %v1232_v2, %v3380_v53  ;;  %v1481_v43 = vrot.slane %v1232_v2, %v3383_v55  ;;  %v1519_v6 = vrot.slane %v1232_v2, %v3386_v57  ;;  %v1193_v7 = vpop.f32.mrf.mxu0  ;;  %v1399_v4 = vld [vmem:[#allocation7 + $0x8] sm:$0xff] }
 0x146   :  { %v1234_v8 = vpop.f32.mrf.mxu1 }
 0x147   :  { %v1425_v11 = vcombine.low %v1404_v63, %v1408_v60  ;;  %v1460_v12 = vcombine.low %v1439_v0, %v1443_v5  ;;  %v1498_v13 = vcombine.low %v1477_v1, %v1481_v43  ;;  %v1536_v17 = vcombine.low %v1515_v54, %v1519_v6  ;;  %v1434_v54 = vld [vmem:[#allocation7 + $0x1c] sm:$0xff]  ;;  %v1472_v6 = vld [vmem:[#allocation7 + $0x30] sm:$0xff] }
 0x149   :  { %v1429_v15 = vmul.f32 %v1425_v11, %v1398_v9  ;;  %v1464_v16 = vmul.f32 %v1460_v12, %v1433_v10  ;;  %v1502_v20 = vmul.f32 %v1498_v13, %v1471_v14  ;;  %v1540_v22 = vmul.f32 %v1536_v17, %v1509_v18  ;;  %v1510_v10 = vld [vmem:[#allocation7 + $0x44] sm:$0xff] }
 0x14b   :  { %v1467_v19 = vadd.f32 %v1464_v16, %v1429_v15 }
 0x14d   :  { %v1505_v21 = vadd.f32 %v1502_v20, %v1467_v19 }
 0x14f   :  { %v1543_v23 = vadd.f32 %v1540_v22, %v1505_v21 }
 0x151   :  { %v1548_v24 = vcombine.high %v1543_v23, %v1543_v23  ;;  %v1552_v27 = vpack.c.bf16 %v1543_v23, %v1543_v23 }
 0x153   :  { %v1553_v25 = vpack.c.bf16 %v1548_v24, %v1548_v24 }
 0x155   :  { %2073 = vmatprep.mubr.bf16.mxu0 %v1553_v25 }
 0x156   :  { %2074 = vmatmul.mubr.bf16.vlgmr.msra.gmra.mxu0 %v1552_v27 }
 0x157   :  { %2124 = vmatpush1.bf16.msra.mxu0 %v3077_v26  ;;  %2155 = vmatprep.mubr.bf16.mxu0 %v3262_v30 }
 0x158   :  { %2125 = vmatprep.subr.bf16.mxu0 %v3082_v28  ;;  %v1400_v28 = vld [vmem:[#allocation7 + $0x10] sm:$0xf] }
 0x15b   :  { %2126 = vmatpush1.bf16.msra.mxu0 %v3080_v29  ;;  %v1435_v29 = vld [vmem:[#allocation7 + $0x24] sm:$0xf] }
 0x15c   :  { %2127 = vmatprep.subr.bf16.mxu0 %v3085_v31 }
 0x15f   :  { %2128 = vmatpush1.bf16.msra.mxu0 %v3083_v32 }
 0x160   :  { %2129 = vmatprep.subr.bf16.mxu0 %v3088_v33 }
 0x163   :  { %2130 = vmatpush1.bf16.msra.mxu0 %v3086_v34 }
 0x164   :  { %2131 = vmatprep.subr.bf16.mxu0 %v3091_v35  ;;  %v1473_v35 = vld [vmem:[#allocation7 + $0x38] sm:$0xf] }
 0x167   :  { %2132 = vmatpush1.bf16.msra.mxu0 %v3089_v36 }
 0x168   :  { %2133 = vmatprep.subr.bf16.mxu0 %v3094_v37 }
 0x16b   :  { %2134 = vmatpush1.bf16.msra.mxu0 %v3092_v59 }
 0x16c   :  { %2135 = vmatprep.subr.bf16.mxu0 %v3097_v62  ;;  %v1511_v62 = vld [vmem:[#allocation7 + $0x4c] sm:$0xf] }
 0x16f   :  { %2136 = vmatpush1.bf16.msra.mxu0 %v3095_v38 }
 0x170   :  { %2137 = vmatprep.subr.bf16.mxu0 %v3100_v39 }
 0x173   :  { %2138 = vmatpush1.bf16.msra.mxu0 %v3098_v40 }
 0x17f   :  { %v1270_v41 = vpop.f32.mrf.mxu0 }
 0x180   :  { %v1311_v42 = vpop.f32.mrf.mxu1 }
 0x181   :  { %v1312_v44 = vadd.f32 %v1311_v42, %v1270_v41  ;;  %v1272_v45 = vpop.f32.mrf.mxu0 }
 0x182   :  { %v1313_v46 = vpop.f32.mrf.mxu1 }
 0x183   :  { %v1412_v47 = vrot.slane %v1312_v44, %v3377_v52  ;;  %v1447_v48 = vrot.slane %v1312_v44, %v3380_v53  ;;  %v1485_v49 = vrot.slane %v1312_v44, %v3383_v55  ;;  %v1314_v50 = vadd.f32 %v1313_v46, %v1272_v45  ;;  %v1274_v51 = vpop.f32.mrf.mxu0  ;;  %v3102_v45 = vld [vmem:[#allocation10 + $0x78] sm:$0xff]  }
 0x184   :  { %v1315_v56 = vpop.f32.mrf.mxu1  ;;  %v1523_v58 = vrot.slane %v1312_v44, %v3386_v57  ;;  %v3103_v46 = vld [vmem:[#allocation10 + $0x38] sm:$0xff]   ;;  %2720 = vmatprep.subr.bf16.mxu1 %v3102_v45  ;;  %v3108_v51 = vld [vmem:[#allocation10 + $0x60] sm:$0xff]  }
 0x185   :  { %v1416_v61 = vrot.slane %v1314_v50, %v3377_v52  ;;  %v1451_v63 = vrot.slane %v1314_v50, %v3380_v53  ;;  %v1489_v0 = vrot.slane %v1314_v50, %v3383_v55  ;;  %v1527_v1 = vrot.slane %v1314_v50, %v3386_v57  ;;  %v1275_v2 = vpop.f32.mrf.mxu0  ;;  %v3107_v50 = vld [vmem:[#allocation10 + $0x28] sm:$0xff]   ;;  %v3109_v56 = vld [vmem:[#allocation10 + $0x20] sm:$0xff]  }
 0x186   :  { %v1316_v3 = vpop.f32.mrf.mxu1  ;;  %v3115_v2 = vld [vmem:[#allocation10 + $0x8] sm:$0xff]   ;;  %v2675_v45 = vld [vmem:[%s3443_s9] ss:$0 sm:$0xff] }
 0x187   :  { %v1426_v60 = vcombine.low %v1412_v47, %v1416_v61  ;;  %v1461_v5 = vcombine.low %v1447_v48, %v1451_v63  ;;  %v1499_v43 = vcombine.low %v1485_v49, %v1489_v0  ;;  %v1537_v9 = vcombine.low %v1523_v58, %v1527_v1  ;;  %v3104_v47 = vld [vmem:[#allocation10 + $0x70] sm:$0xff]   ;;  %v3106_v49 = vld [vmem:[#allocation10 + $0x68] sm:$0xff]   ;;  %v3110_v58 = vld [vmem:[#allocation10 + $0x58] sm:$0xff]  }
 0x188   :  { %v3105_v48 = vld [vmem:[#allocation10 + $0x30] sm:$0xff]   ;;  %v3111_v61 = vld [vmem:[#allocation10 + $0x18] sm:$0xff]   ;;  %v3114_v1 = vld [vmem:[#allocation10 + $0x48] sm:$0xff]  }
 0x189   :  { %v1430_v7 = vmul.f32 %v1426_v60, %v1399_v4  ;;  %v1465_v8 = vmul.f32 %v1461_v5, %v1434_v54  ;;  %v1503_v12 = vmul.f32 %v1499_v43, %v1472_v6  ;;  %v1541_v14 = vmul.f32 %v1537_v9, %v1510_v10  ;;  %v3112_v63 = vld [vmem:[#allocation10 + $0x50] sm:$0xff]   ;;  %v3116_v3 = vld [vmem:[#allocation10 + $0x40] sm:$0xff]  }
 0x18a   :  { %v3113_v0 = vld [vmem:[#allocation10 + $0x10] sm:$0xff]   ;;  %v3117_v4 = vld [vmem:[#allocation10] sm:$0xff]  }
 0x18b   :  { %v1468_v11 = vadd.f32 %v1465_v8, %v1430_v7  ;;  %v1637_v10 = vld [vmem:[%s3439_s5] sm:$0xff] }
 0x18d   :  { %v1506_v13 = vadd.f32 %v1503_v12, %v1468_v11  ;;  %v2039_v11 = vcombine.high %v1637_v10, %v1637_v10 }
 0x18f   :  { %v1544_v15 = vadd.f32 %v1541_v14, %v1506_v13 }
 0x191   :  { %v1549_v16 = vcombine.high %v1544_v15, %v1544_v15  ;;  %v1554_v18 = vpack.c.bf16 %v1544_v15, %v1544_v15 }
 0x193   :  { %v1555_v17 = vpack.c.bf16 %v1549_v16, %v1549_v16 }
 0x195   :  { %2114 = vmatprep.mubr.bf16.mxu1 %v1555_v17 }
 0x196   :  { %2115 = vmatmul.mubr.bf16.vlgmr.msra.gmra.mxu1 %v1554_v18 }
 0x197   :  { %2721 = vmatpush3.bf16.msra.mxu1 %v3103_v46 }
 0x198   :  { %2722 = vmatprep.subr.bf16.mxu1 %v3104_v47 }
 0x19b   :  { %2723 = vmatpush3.bf16.msra.mxu1 %v3105_v48  ;;  %v105_v48 = vld [vmem:[#allocation2] sm:$0xff] }
 0x19c   :  { %2724 = vmatprep.subr.bf16.mxu1 %v3106_v49  ;;  %v106_v49 = vld [vmem:[#allocation2 + $0x8] sm:$0xff] }
 0x19f   :  { %v2692_v19 = vpop.f32.mrf.mxu0  ;;  %2725 = vmatpush3.bf16.msra.mxu1 %v3107_v50 }
 0x1a0   :  { %v2714_v20 = vpop.f32.mrf.mxu1  ;;  %2726 = vmatprep.subr.bf16.mxu1 %v3108_v51 }
 0x1a1   :  { %v2693_v21 = vpop.f32.mrf.mxu0 }
 0x1a2   :  { %v2715_v22 = vpop.f32.mrf.mxu1  ;;  %v2694_v23 = vadd.f32 %v2693_v21, %v2692_v19 }
 0x1a3   :  { %v2716_v24 = vadd.f32 %v2715_v22, %v2714_v20  ;;  %v2695_v25 = vpop.f32.mrf.mxu0  ;;  %2727 = vmatpush3.bf16.msra.mxu1 %v3109_v56 }
 0x1a4   :  { %v2717_v26 = vpop.f32.mrf.mxu1  ;;  %2728 = vmatprep.subr.bf16.mxu1 %v3110_v58  ;;  %v2657_v25 = vld [vmem:[%s3441_s7] ss:$0 sm:$0xff] }
 0x1a5   :  { %v1393_v27 = vadd.f32 %v2716_v24, %v2694_v23  ;;  %v2696_v30 = vpop.f32.mrf.mxu0 }
 0x1a6   :  { %v2718_v31 = vpop.f32.mrf.mxu1 }
 0x1a7   :  { %v1420_v32 = vrot.slane %v1393_v27, %v3377_v52  ;;  %v1455_v33 = vrot.slane %v1393_v27, %v3380_v53  ;;  %v1493_v34 = vrot.slane %v1393_v27, %v3383_v55  ;;  %v1531_v59 = vrot.slane %v1393_v27, %v3386_v57  ;;  %2729 = vmatpush3.bf16.msra.mxu1 %v3111_v61 }
 0x1a8   :  { %2730 = vmatprep.subr.bf16.mxu1 %v3112_v63 }
 0x1a9   :  { %v1431_v36 = vmul.f32 %v1420_v32, %v1400_v28  ;;  %v1466_v37 = vmul.f32 %v1455_v33, %v1435_v29  ;;  %v1504_v39 = vmul.f32 %v1493_v34, %v1473_v35  ;;  %v1542_v41 = vmul.f32 %v1531_v59, %v1511_v62 }
 0x1ab   :  { %v1469_v38 = vadd.f32 %v1466_v37, %v1431_v36  ;;  %2731 = vmatpush3.bf16.msra.mxu1 %v3113_v0 }
 0x1ac   :  { %2732 = vmatprep.subr.bf16.mxu1 %v3114_v1 }
 0x1ad   :  { %v1507_v40 = vadd.f32 %v1504_v39, %v1469_v38 }
 0x1af   :  { %v1545_v42 = vadd.f32 %v1542_v41, %v1507_v40  ;;  %2733 = vmatpush3.bf16.msra.mxu1 %v3115_v2 }
 0x1b0   :  { %2734 = vmatprep.subr.bf16.mxu1 %v3116_v3 }
 0x1b1   :  { %v1556_v44 = vpack.c.bf16 %v1545_v42, %v1545_v42  ;;  %v2674_v42 = vld [vmem:[%s3442_s8] ss:$0 sm:$0xff]  ;;  %s3222_s8 = scalar_lea.vmem %s2404_s2, 256 }
 0x1b2   :  { %p3223_p11 = scmp.ne.s32.totalorder %s2404_s2, %s3222_s8  ;;  %p3228_p13 = scmp.lt.s32.totalorder %s3222_s8, %s3222_s8 }
 0x1b3   :  { %2156 = vmatmul.mubr.bf16.vlgmr.msra.gmra.mxu0 %v1556_v44  ;;  %2735 = vmatpush3.bf16.msra.mxu1 %v3117_v4 }
 0x1b4   :  { %p3229_p0 = por %p3228_p13, %p3227_p12 }
 0x1b6   :  { %p3230_p1 = pnand %p3229_p0, %p3223_p11 }
 0x216   :  { %v2075_v54 = vpop.f32.mrf.mxu0 }
 0x217   :  { %v2076_v12 = vadd.f32 %v2075_v54, %v1637_v10 }
 0x218   :  { %v2077_v60 = vpop.f32.mrf.mxu0 }
 0x219   :  { %v2078_v13 = vadd.f32 %v2077_v60, %v2039_v11 }
 0x21a   :  { %v2079_v5 = vpop.f32.mrf.mxu0 }
 0x21c   :  { %v2080_v43 = vpop.f32.mrf.mxu0 }
 0x256   :  { %v2116_v6 = vpop.f32.mrf.mxu1 }
 0x257   :  { %v2117_v14 = vadd.f32 %v2116_v6, %v2076_v12 }
 0x258   :  { %v2118_v7 = vpop.f32.mrf.mxu1 }
 0x259   :  { %v2119_v16 = vadd.f32 %v2118_v7, %v2078_v13 }
 0x25a   :  { %v2120_v8 = vpop.f32.mrf.mxu1 }
 0x25c   :  { %v2121_v9 = vpop.f32.mrf.mxu1 }
 0x273   :  { %v2157_v15 = vpop.f32.mrf.mxu0 }
 0x274   :  { %v2158_v17 = vadd.f32 %v2157_v15, %v2117_v14 }
 0x275   :  { %v2159_v18 = vpop.f32.mrf.mxu0 }
 0x276   :  { %v2160_v19 = vadd.f32 %v2159_v18, %v2119_v16  ;;  %v2164_v22 = vpack.c.bf16 %v2158_v17, %v2158_v17 }
 0x277   :  { %v2161_v20 = vpop.f32.mrf.mxu0 }
 0x278   :  { %v2165_v21 = vpack.c.bf16 %v2160_v19, %v2160_v19 }
 0x279   :  { %v2162_v23 = vpop.f32.mrf.mxu0 }
 0x27a   :  { %2333 = vmatprep.mubr.bf16.mxu1 %v2165_v21 }
 0x27b   :  { %2334 = vmatmul.mubr.bf16.vlgmr.msra.gmra.mxu1 %v2164_v22 }
 0x33b   :  { %v2736_v24 = vpop.f32.mrf.mxu1 }
 0x33d   :  { %v2737_v26 = vpop.f32.mrf.mxu1 }
 0x33e   :  { %v2738_v27 = vadd.f32 %v2737_v26, %v2736_v24 }
 0x33f   :  { %v2739_v28 = vpop.f32.mrf.mxu1 }
 0x340   :  { %v2336_v29 = vadd.f32 %v2738_v27, %v2657_v25 }
 0x341   :  { %v2740_v30 = vpop.f32.mrf.mxu1 }
 0x342   :  { %3118 = vtanh.f32 %v2336_v29 }
 0x34f   :  { %v3119_v31 = vpop.eup %3118 }
 0x350   :  { %v2343_v32 = vsel %vm2342_vm0, %v3119_v31, 0.0  ;;  %v2347_v33 = vmul.f32 %v3119_v31, %v3119_v31 }
 0x351   :  { %2344 = vadd.xlane.f32.xlu0 %v2343_v32 }
 0x352   :  { %v2348_v34 = vsel %vm2342_vm0, %v2347_v33, 0.0 }
 0x355   :  { %2349 = vadd.xlane.f32.xlu0 %v2348_v34 }
 0x3da   :  { %v2345_v35 = vpop.xlane.xlu0 %2344 }
 0x3db   :  { %v2346_v36 = vmul.f32 0.0078125, %v2345_v35 }
 0x3dd   :  { %v2352_v59 = vmul.f32 %v2346_v36, %v2346_v36  ;;  %v2354_v40 = vsub.f32 %v3119_v31, %v2346_v36 }
 0x3de   :  { %v2350_v37 = vpop.xlane.xlu0 %2349 }
 0x3df   :  { %v2351_v62 = vmul.f32 0.0078125, %v2350_v37 }
 0x3e1   :  { %v2353_v38 = vsub.f32 %v2351_v62, %v2352_v59 }
 0x3e3   :  { %v2355_v39 = vadd.f32 1e-05, %v2353_v38 }
 0x3e5   :  { %3120 = vrsqrt.f32 %v2355_v39 }
 0x3f2   :  { %v3121_v41 = vpop.eup %3120 }
 0x3f3   :  { %v2357_v44 = vmul.f32 %v3121_v41, %v2354_v40 }
 0x3f5   :  { %v2365_v46 = vmul.f32 %v2674_v42, %v2357_v44 }
 0x3f7   :  { %v2373_v47 = vadd.f32 %v2675_v45, %v2365_v46 }
 0x3f9   :  { %v2377_v50 = vrot.slane %v2373_v47, %v3377_v52  ;;  %v2382_v51 = vrot.slane %v2373_v47, %v3380_v53  ;;  %v2387_v56 = vrot.slane %v2373_v47, %v3383_v55  ;;  %v2392_v58 = vrot.slane %v2373_v47, %v3386_v57 }
 0x3fb   :  { %v2378_v61 = vadd.f32 %v2377_v50, %v105_v48  ;;  %v2383_v63 = vadd.f32 %v2382_v51, %v105_v48  ;;  %v2388_v0 = vadd.f32 %v2387_v56, %v106_v49  ;;  %v2393_v1 = vadd.f32 %v2392_v58, %v106_v49 }
 0x3fd   :  { %v2394_v2 = vsel %vm2342_vm0, %v2378_v61, %v2383_v63  ;;  %v2395_v3 = vsel %vm2342_vm0, %v2388_v0, %v2393_v1 }
 0x3fe   :  { %2396 = vst [vmem:[#allocation11] sm:$0xff] %v2394_v2  ;;  %2397 = vst [vmem:[#allocation11 + $0x8] sm:$0xff] %v2395_v3 }
 0x3ff   :  { %3233 = shalt.err (!%p3230_p1)
}
 0x400   :  { %2409 = dma.vmem_to_hbm [thread:$0]  %s2404_s2, 256, %s3444_s10, [#allocation4], %s3255_s25, %s3255_s25, %s3256_s26  }
 0x401   :  { %3248 = dma.done.wait [#allocation4], 256  }
 0x402   :  { %3249 = vsyncadd [#allocation4], 4294967040 }
 0x403   :  { %2413 = vsyncpa [#allocation3], 1 }
 0x404   :  { %2414 = vsyncpa [#allocation6], 1 }
 0x405   :  { %2415 = vsyncpa [#allocation9], 1 }
 0x406   :  { %2416 = vsyncpa [#allocation4], 1 }

</bundles_post_ra>
